<compile_context>
chip_gen: v7x
topology: tpu7x:2x2x1
jax: 0.10.0
libtpu: 0.0.40
codegen_flags: <defaults>
</compile_context>

<pallas_src>
import jax
import jax.numpy as jnp
from jax.experimental import pallas as pl
from jax.experimental.pallas import tpu as pltpu

IMGSIZE = 64
LATENT_DIMS = 5
HIDDEN = 30
OUT_DIM = IMGSIZE * IMGSIZE  # 4096

LATENT_PAD = 8     # sublane-friendly
HIDDEN_PAD = 128   # lane-friendly
MAX_TB = 512       # batch tile: 2x(512,4096)f32 out buffers = 16 MiB, v7x-safe


def decoder_kernel(z_ref, w1_ref, b1_ref, w2_ref, b2_ref, o_ref):
    # z: (TB, LP), w1: (LP, HP), b1: (1, HP), w2: (HP, O), b2: (1, O), o: (TB, O)
    h = jnp.dot(z_ref[...], w1_ref[...], preferred_element_type=jnp.float32)
    h = jnp.maximum(h + b1_ref[...], 0.0)          # bias bcast + ReLU
    y = jnp.dot(h, w2_ref[...], preferred_element_type=jnp.float32)
    y = y + b2_ref[...]
    # sigmoid(y) == 0.5 * (tanh(0.5*y) + 1): single EUP transcendental.
    o_ref[...] = (0.5 * (jnp.tanh(0.5 * y) + 1.0)).astype(o_ref.dtype)


def decoder_forward(z, w1, b1, w2, b2):
    """z: (B, LATENT_DIMS) f32 -> (B, 1, IMGSIZE, IMGSIZE) f32."""
    B = z.shape[0]

    # Zero-pad the tiny latent/hidden dims to lane/sublane-aligned sizes.
    # Padded hidden units see bias 0 -> relu(0) = 0, and the corresponding
    # rows of w2 are zero, so results are bit-for-bit equivalent.
    zp = jnp.pad(z, ((0, 0), (0, LATENT_PAD - LATENT_DIMS)))
    w1p = jnp.pad(w1, ((0, LATENT_PAD - LATENT_DIMS), (0, HIDDEN_PAD - HIDDEN)))
    b1p = jnp.pad(b1, ((0, 0), (0, HIDDEN_PAD - HIDDEN)))
    w2p = jnp.pad(w2, ((0, HIDDEN_PAD - HIDDEN), (0, 0)))

    # Batch tile: full batch if small, else 512-row tiles (edge block masked
    # by Pallas when B % TB != 0).
    tb = B if B <= MAX_TB else MAX_TB
    grid = (pl.cdiv(B, tb),)

    out = pl.pallas_call(
        decoder_kernel,
        out_shape=jax.ShapeDtypeStruct((B, OUT_DIM), jnp.float32),
        grid=grid,
        in_specs=[
            pl.BlockSpec((tb, LATENT_PAD), lambda i: (i, 0)),
            # Constant index maps -> weights/biases stay resident in VMEM.
            pl.BlockSpec((LATENT_PAD, HIDDEN_PAD), lambda i: (0, 0)),
            pl.BlockSpec((1, HIDDEN_PAD), lambda i: (0, 0)),
            pl.BlockSpec((HIDDEN_PAD, OUT_DIM), lambda i: (0, 0)),
            pl.BlockSpec((1, OUT_DIM), lambda i: (0, 0)),
        ],
        out_specs=pl.BlockSpec((tb, OUT_DIM), lambda i: (i, 0)),
        compiler_params=pltpu.CompilerParams(
            dimension_semantics=("parallel",),   # shard batch across TCs (v7x)
            vmem_limit_bytes=48 << 20,           # headroom for 512-row tiles
        ),
    )(zp, w1p, b1p, w2p, b2)
    return out.reshape(B, 1, IMGSIZE, IMGSIZE)


def init_params(key):
    """Deterministic init mimicking nn.Linear's uniform(-1/sqrt(fan_in), ...)."""
    k1, k2, k3, k4 = jax.random.split(key, 4)
    bound1 = 1.0 / (LATENT_DIMS ** 0.5)
    bound2 = 1.0 / (HIDDEN ** 0.5)
    # Stored as (in, out) so the kernel does x @ W (equivalent to x @ W_pt.T).
    w1 = jax.random.uniform(k1, (LATENT_DIMS, HIDDEN), jnp.float32, -bound1, bound1)
    b1 = jax.random.uniform(k2, (1, HIDDEN), jnp.float32, -bound1, bound1)
    w2 = jax.random.uniform(k3, (HIDDEN, OUT_DIM), jnp.float32, -bound2, bound2)
    b2 = jax.random.uniform(k4, (1, OUT_DIM), jnp.float32, -bound2, bound2)
    return w1, b1, w2, b2


def _reference(z, w1, b1, w2, b2):
    h = jnp.maximum(z @ w1 + b1, 0.0)
    y = jax.nn.sigmoid(h @ w2 + b2)
    return y.reshape(z.shape[0], 1, IMGSIZE, IMGSIZE)


if __name__ == "__main__":
    key = jax.random.PRNGKey(0)
    kz, kp, kz2 = jax.random.split(key, 3)
    w1, b1, w2, b2 = init_params(kp)

    # Small-shape check (single grid step, full-batch block).
    B = 2
    z = jax.random.normal(kz, (B, LATENT_DIMS), jnp.float32)
    out = jax.block_until_ready(decoder_forward(z, w1, b1, w2, b2))
    ref = _reference(z, w1, b1, w2, b2)
    assert out.shape == (B, 1, IMGSIZE, IMGSIZE)
    assert jnp.allclose(out, ref, atol=1e-5, rtol=1e-5)

    # Larger batch to exercise the tiled / double-buffered path (incl. an
    # uneven edge block: 600 = 512 + 88).
    B2 = 600
    z2 = jax.random.normal(kz2, (B2, LATENT_DIMS), jnp.float32)
    out2 = jax.block_until_ready(decoder_forward(z2, w1, b1, w2, b2))
    ref2 = _reference(z2, w1, b1, w2, b2)
    assert out2.shape == (B2, 1, IMGSIZE, IMGSIZE)
    assert jnp.allclose(out2, ref2, atol=1e-5, rtol=1e-5)

    print("KERNEL_OK")
</pallas_src>

<mosaic_0001>
module attributes {stable_mosaic.version = 11 : i64} {
  func.func @decoder_kernel(%arg0: i32, %arg1: memref<2x8xf32, #tpu.memory_space<vmem>>, %arg2: memref<8x128xf32, #tpu.memory_space<vmem>>, %arg3: memref<1x128xf32, #tpu.memory_space<vmem>>, %arg4: memref<128x4096xf32, #tpu.memory_space<vmem>>, %arg5: memref<1x4096xf32, #tpu.memory_space<vmem>>, %arg6: memref<2x4096xf32, #tpu.memory_space<vmem>>) attributes {dimension_semantics = [#tpu.dimension_semantics<parallel>], iteration_bounds = array<i64: 1>, scalar_prefetch = 0 : i64, scratch_operands = 0 : i64, tpu.core_type = #tpu.core_type<tc>, window_params = [{transform_indices = @transform_0, window_bounds = array<i64: 2, 8>}, {pipeline_mode = #tpu.pipeline_mode<synchronous>, transform_indices = @transform_1, window_bounds = array<i64: 8, 128>}, {pipeline_mode = #tpu.pipeline_mode<synchronous>, transform_indices = @transform_2, window_bounds = array<i64: 1, 128>}, {pipeline_mode = #tpu.pipeline_mode<synchronous>, transform_indices = @transform_3, window_bounds = array<i64: 128, 4096>}, {pipeline_mode = #tpu.pipeline_mode<synchronous>, transform_indices = @transform_4, window_bounds = array<i64: 1, 4096>}, {transform_indices = @transform_5, window_bounds = array<i64: 2, 4096>}]} {
    %c0 = arith.constant 0 : index
    %c0_0 = arith.constant 0 : index
    %0 = vector.load %arg1[%c0, %c0_0] : memref<2x8xf32, #tpu.memory_space<vmem>>, vector<2x8xf32>
    %c0_1 = arith.constant 0 : index
    %c0_2 = arith.constant 0 : index
    %1 = vector.load %arg2[%c0_1, %c0_2] : memref<8x128xf32, #tpu.memory_space<vmem>>, vector<8x128xf32>
    %cst = arith.constant dense<0.000000e+00> : vector<2x128xf32>
    %2 = tpu.matmul %0, %1, %cst {dimension_numbers = #tpu.dot_dimension_numbers<[1], [0], [0], [1], [0, 0, 1, 1], [], []>} : vector<2x8xf32>, vector<8x128xf32>, vector<2x128xf32> -> vector<2x128xf32>
    %c0_3 = arith.constant 0 : index
    %c0_4 = arith.constant 0 : index
    %3 = vector.load %arg3[%c0_3, %c0_4] : memref<1x128xf32, #tpu.memory_space<vmem>>, vector<1x128xf32>
    %4 = vector.broadcast %3 : vector<1x128xf32> to vector<2x128xf32>
    %5 = arith.addf %2, %4 : vector<2x128xf32>
    %cst_5 = arith.constant 0.000000e+00 : f32
    %6 = vector.broadcast %cst_5 : f32 to vector<2x128xf32>
    %7 = arith.maximumf %5, %6 : vector<2x128xf32>
    %c0_6 = arith.constant 0 : index
    %c0_7 = arith.constant 0 : index
    %8 = vector.load %arg4[%c0_6, %c0_7] : memref<128x4096xf32, #tpu.memory_space<vmem>>, vector<128x4096xf32>
    %cst_8 = arith.constant dense<0.000000e+00> : vector<2x4096xf32>
    %9 = tpu.matmul %7, %8, %cst_8 {dimension_numbers = #tpu.dot_dimension_numbers<[1], [0], [0], [1], [0, 0, 1, 1], [], []>} : vector<2x128xf32>, vector<128x4096xf32>, vector<2x4096xf32> -> vector<2x4096xf32>
    %c0_9 = arith.constant 0 : index
    %c0_10 = arith.constant 0 : index
    %10 = vector.load %arg5[%c0_9, %c0_10] : memref<1x4096xf32, #tpu.memory_space<vmem>>, vector<1x4096xf32>
    %11 = vector.broadcast %10 : vector<1x4096xf32> to vector<2x4096xf32>
    %12 = arith.addf %9, %11 : vector<2x4096xf32>
    %cst_11 = arith.constant 5.000000e-01 : f32
    %13 = vector.broadcast %cst_11 : f32 to vector<2x4096xf32>
    %14 = arith.mulf %13, %12 : vector<2x4096xf32>
    %15 = math.tanh %14 : vector<2x4096xf32>
    %cst_12 = arith.constant 1.000000e+00 : f32
    %16 = vector.broadcast %cst_12 : f32 to vector<2x4096xf32>
    %17 = arith.addf %15, %16 : vector<2x4096xf32>
    %cst_13 = arith.constant 5.000000e-01 : f32
    %18 = vector.broadcast %cst_13 : f32 to vector<2x4096xf32>
    %19 = arith.mulf %18, %17 : vector<2x4096xf32>
    %c0_14 = arith.constant 0 : index
    %c0_15 = arith.constant 0 : index
    %20 = vector.load %arg6[%c0_14, %c0_15] : memref<2x4096xf32, #tpu.memory_space<vmem>>, vector<2x4096xf32>
    tpu.vector_store %arg6[%c0_14, %c0_15], %19 {strides = array<i32>} : memref<2x4096xf32, #tpu.memory_space<vmem>>, vector<2x4096xf32>,
    return
  }
  func.func @transform_0(%arg0: i32) -> (i32, i32) {
    %c0_i32 = arith.constant 0 : i32
    %c0_i32_0 = arith.constant 0 : i32
    return %arg0, %c0_i32 : i32, i32
  }
  func.func @transform_1(%arg0: i32) -> (i32, i32) {
    %c0_i32 = arith.constant 0 : i32
    %c0_i32_0 = arith.constant 0 : i32
    %c0_i32_1 = arith.constant 0 : i32
    return %c0_i32, %c0_i32_0 : i32, i32
  }
  func.func @transform_2(%arg0: i32) -> (i32, i32) {
    %c0_i32 = arith.constant 0 : i32
    %c0_i32_0 = arith.constant 0 : i32
    %c0_i32_1 = arith.constant 0 : i32
    return %c0_i32, %c0_i32_0 : i32, i32
  }
  func.func @transform_3(%arg0: i32) -> (i32, i32) {
    %c0_i32 = arith.constant 0 : i32
    %c0_i32_0 = arith.constant 0 : i32
    %c0_i32_1 = arith.constant 0 : i32
    return %c0_i32, %c0_i32_0 : i32, i32
  }
  func.func @transform_4(%arg0: i32) -> (i32, i32) {
    %c0_i32 = arith.constant 0 : i32
    %c0_i32_0 = arith.constant 0 : i32
    %c0_i32_1 = arith.constant 0 : i32
    return %c0_i32, %c0_i32_0 : i32, i32
  }
  func.func @transform_5(%arg0: i32) -> (i32, i32) {
    %c0_i32 = arith.constant 0 : i32
    %c0_i32_0 = arith.constant 0 : i32
    return %arg0, %c0_i32 : i32, i32
  }
}

</mosaic_0001>

<bundles_post_ra>
// kernel: tpu_custom_call.1
= control target key start
LH: loop header
LB: loop body
LE: loop exit
PB: predicated region body
PF: predicated region fallthrough
CT: control target
= control target key end

     0   :  { %10 = vsyncpa [#allocation3], 0  ;;  %s3289_s0 = inlined_call_operand.hbm [shape: f32[2,8], index: 0, kind: input, shape index: {}]   ;;  %s3290_s1 = inlined_call_operand.hbm [shape: f32[8,128], index: 1, kind: input, shape index: {}]   ;;  %s3291_s2 = inlined_call_operand.hbm [shape: f32[1,128], index: 2, kind: input, shape index: {}]   ;;  %s3292_s3 = inlined_call_operand.hbm [shape: f32[128,4096], index: 3, kind: input, shape index: {}]   ;;  %s3293_s4 = inlined_call_operand.hbm [shape: f32[1,4096], index: 4, kind: input, shape index: {}]   ;;  %s3294_s5 = inlined_call_operand.hbm [shape: f32[2,4096], index: 5, kind: output, shape index: {}]  }
   0x1   :  { %11 = vsyncpa [#allocation6], 0 }
   0x2   :  { %12 = vsyncpa [#allocation9], 0 }
   0x3   :  { %13 = vsyncpa [#allocation4], 0  ;;  %s3046_s18 = smov [#allocation5]   ;;  %s3047_s20 = smov [#allocation8]  }
   0x4   :  { %s30_s19 = sshll.u32 %s3046_s18, 4  ;;  %s49_s21 = sshll.u32 %s3047_s20, 4  ;;  %s31_s19 = int_to_ptr.vmem [resolvable:$true] %s30_s19  ;;  %s3087_s21 = int_to_ptr.vmem [resolvable:$true] %s49_s21 }
   0x5   :  { %s2906_s24 = scalar_lea.hbm %s3290_s1, 128 }
   0x6   :  { %p2907_p0 = scmp.ne.s32.totalorder %s3290_s1, %s2906_s24  ;;  %p2910_p1 = scmp.lt.u32.totalorder %s2906_s24, %s3290_s1 }
   0x8   :  { %p2912_p2 = pnand %p2910_p1, %p2907_p0 }
   0xa   :  { %2915 = shalt.err (!%p2912_p2)
}
   0xb   :  { %s2916_s29 = scalar_lea.vmem %s31_s19, 128  ;;  %p2921_p4 = scmp.lt.s32.totalorder %s31_s19, %s31_s19 }
   0xc   :  { %p2917_p3 = scmp.ne.s32.totalorder %s31_s19, %s2916_s29  ;;  %p2922_p5 = scmp.lt.s32.totalorder %s2916_s29, %s2916_s29 }
   0xe   :  { %p2923_p6 = por %p2922_p5, %p2921_p4 }
  0x10   :  { %p2924_p7 = pnand %p2923_p6, %p2917_p3 }
  0x12   :  { %2927 = shalt.err (!%p2924_p7)
}
  0x13   :  { %33 = dma.hbm_to_vmem [thread:$0]  %s3290_s1, 128, %s31_s19, [#allocation6]  }
  0x14   :  { %s2928_s9 = scalar_lea.hbm %s3292_s3, 65536 }
  0x15   :  { %p2929_p8 = scmp.ne.s32.totalorder %s3292_s3, %s2928_s9  ;;  %p2932_p9 = scmp.lt.u32.totalorder %s2928_s9, %s3292_s3 }
  0x17   :  { %p2934_p10 = pnand %p2932_p9, %p2929_p8 }
  0x19   :  { %2937 = shalt.err (!%p2934_p10)
}
  0x1a   :  { %s2938_s14 = scalar_lea.vmem %s3087_s21, 65536  ;;  %p2943_p12 = scmp.lt.s32.totalorder %s3087_s21, %s3087_s21 }
  0x1b   :  { %p2939_p11 = scmp.ne.s32.totalorder %s3087_s21, %s2938_s14  ;;  %p2944_p13 = scmp.lt.s32.totalorder %s2938_s14, %s2938_s14 }
  0x1d   :  { %p2945_p0 = por %p2944_p13, %p2943_p12 }
  0x1f   :  { %p2946_p1 = pnand %p2945_p0, %p2939_p11 }
  0x21   :  { %2949 = shalt.err (!%p2946_p1)
}
  0x22   :  { %s3048_s1 = smov 4096   ;;  %s3049_s15 = smov 256  }
  0x23   :  { %55 = dma.hbm_to_vmem [thread:$0]  %s3292_s3, 65536, %s3087_s21, [#allocation9], %s3048_s1, %s3048_s1, %s3049_s15  }
  0x24   :  { %s3050_s18 = smov [#allocation2]   ;;  %s3051_s20 = smov [#allocation7]  }
  0x25   :  { %s20_s19 = sshll.u32 %s3050_s18, 4  ;;  %s40_s22 = sshll.u32 %s3051_s20, 4  ;;  %s21_s19 = int_to_ptr.vmem [resolvable:$true] %s20_s19  ;;  %s41_s22 = int_to_ptr.vmem [resolvable:$true] %s40_s22 }
  0x26   :  { %s2950_s25 = scalar_lea.hbm %s3289_s0, 32 }
  0x27   :  { %p2951_p2 = scmp.ne.s32.totalorder %s3289_s0, %s2950_s25  ;;  %p2954_p3 = scmp.lt.u32.totalorder %s2950_s25, %s3289_s0 }
  0x29   :  { %p2956_p4 = pnand %p2954_p3, %p2951_p2 }
  0x2b   :  { %2959 = shalt.err (!%p2956_p4)
}
  0x2c   :  { %s2960_s3 = scalar_lea.vmem %s21_s19, 32  ;;  %p2965_p6 = scmp.lt.s32.totalorder %s21_s19, %s21_s19 }
  0x2d   :  { %p2961_p5 = scmp.ne.s32.totalorder %s21_s19, %s2960_s3  ;;  %p2966_p7 = scmp.lt.s32.totalorder %s2960_s3, %s2960_s3 }
  0x2f   :  { %p2967_p8 = por %p2966_p7, %p2965_p6 }
  0x31   :  { %p2968_p9 = pnand %p2967_p8, %p2961_p5 }
  0x33   :  { %2971 = shalt.err (!%p2968_p9)
}
  0x34   :  { %23 = dma.hbm_to_vmem [thread:$0]  %s3289_s0, 32, %s21_s19, [#allocation3]  }
  0x35   :  { %s2972_s8 = scalar_lea.hbm %s3291_s2, 16 }
  0x36   :  { %p2973_p10 = scmp.ne.s32.totalorder %s3291_s2, %s2972_s8  ;;  %p2976_p11 = scmp.lt.u32.totalorder %s2972_s8, %s3291_s2 }
  0x38   :  { %p2978_p12 = pnand %p2976_p11, %p2973_p10 }
  0x3a   :  { %2981 = shalt.err (!%p2978_p12)
}
  0x3b   :  { %s2982_s13 = scalar_lea.vmem %s41_s22, 16  ;;  %s2986_s14 = scalar_lea.vmem %s41_s22, 32 }
  0x3c   :  { %p2983_p13 = scmp.ne.s32.totalorder %s41_s22, %s2982_s13  ;;  %p2987_p0 = scmp.lt.s32.totalorder %s41_s22, %s41_s22 }
  0x3d   :  { %p2988_p1 = scmp.lt.s32.totalorder %s2986_s14, %s2982_s13 }
  0x3f   :  { %p2989_p2 = por %p2988_p1, %p2987_p0 }
  0x41   :  { %p2990_p3 = pnand %p2989_p2, %p2983_p13 }
  0x43   :  { %2993 = shalt.err (!%p2990_p3)
}
  0x44   :  { %43 = dma.hbm_to_vmem [thread:$0]  %s3291_s2, 16, %s41_s22, [#allocation6]  }
  0x45   :  { %s3052_s15 = smov [#allocation10]   ;;  %s2994_s19 = scalar_lea.hbm %s3293_s4, 512 }
  0x46   :  { %s62_s16 = sshll.u32 %s3052_s15, 4  ;;  %p2995_p4 = scmp.ne.s32.totalorder %s3293_s4, %s2994_s19  ;;  %s63_s16 = int_to_ptr.vmem [resolvable:$true] %s62_s16 }
  0x47   :  { %p2998_p5 = scmp.lt.u32.totalorder %s2994_s19, %s3293_s4 }
  0x49   :  { %p3000_p6 = pnand %p2998_p5, %p2995_p4 }
  0x4b   :  { %3003 = shalt.err (!%p3000_p6)
}
  0x4c   :  { %s3004_s26 = scalar_lea.vmem %s63_s16, 512  ;;  %p3009_p8 = scmp.lt.s32.totalorder %s63_s16, %s63_s16 }
  0x4d   :  { %p3005_p7 = scmp.ne.s32.totalorder %s63_s16, %s3004_s26  ;;  %p3010_p9 = scmp.lt.s32.totalorder %s3004_s26, %s3004_s26 }
  0x4f   :  { %p3011_p10 = por %p3010_p9, %p3009_p8 }
  0x51   :  { %p3012_p11 = pnand %p3011_p10, %p3005_p7 }
  0x53   :  { %3015 = shalt.err (!%p3012_p11)
}
  0x54   :  { %65 = dma.hbm_to_vmem [thread:$0]  %s3293_s4, 512, %s63_s16, [#allocation9]  }
  0x55   :  { %3038 = dma.done.wait [#allocation3], 32  }
  0x56   :  { %3039 = vsyncadd [#allocation3], 4294967264 }
  0x57   :  { %3040 = dma.done.wait [#allocation6], 144  }
  0x58   :  { %3041 = vsyncadd [#allocation6], 4294967152 }
  0x59   :  { %3042 = dma.done.wait [#allocation9], 66048  }
  0x5a   :  { %3043 = vsyncadd [#allocation9], 4294901248  ;;  %v3053_v0 = vmov 0.0   ;;  %vm3054_vm0 = vmmov 0   ;;  %vm90_vm1 = vcmask 64512   ;;  %v82_v1 = vld [vmem:[#allocation5] sm:$0xff] }
  0x5b   :  { %2314 = vmatprep.subr.mxu0 %v3053_v0  ;;  %2316 = vmatprep.mubr.msk.f32.mxu0 %vm3054_vm0, %v3053_v0  ;;  %v81_v2 = vld [vmem:[#allocation2] sm:$0x3]  ;;  %v166_v3 = vld [vmem:[#allocation8 + $0x8] sm:$0xff]  ;;  %v168_v5 = vld [vmem:[#allocation8 + $0x18] sm:$0xff]  ;;  %s3056_s4 = smov [#allocation11]  }
  0x5c   :  { %909 = vmatprep.mubr.f32.mxu1 %v3053_v0  ;;  %2315 = vmatpush3.msra.mxu0 %v82_v1  ;;  %v198_v4 = vld [vmem:[#allocation8 + $0x108] sm:$0xff]  ;;  %v200_v6 = vld [vmem:[#allocation8 + $0x118] sm:$0xff]  ;;  %v165_v9 = vld [vmem:[#allocation8] sm:$0xff]  ;;  %s2299_s27 = sshll.u32 %s3056_s4, 4  ;;  %s2300_s27 = int_to_ptr.vmem [resolvable:$true] %s2299_s27 }
  0x5d   :  { %2317 = vmatmul.mubr.msk.f32.vlgmr.msra.gmra.mrb[0].mxu0 %vm90_vm1, %v81_v2  ;;  %v2319_v7 = vpack.c.bf16 %v198_v4, %v166_v3  ;;  %v2351_v8 = vpack.c.bf16 %v200_v6, %v168_v5  ;;  %v197_v10 = vld [vmem:[#allocation8 + $0x100] sm:$0xff]  ;;  %v167_v11 = vld [vmem:[#allocation8 + $0x10] sm:$0xff]  ;;  %v230_v14 = vld [vmem:[#allocation8 + $0x208] sm:$0xff]  ;;  %s3016_s28 = scalar_lea.vmem %s2300_s27, 1024  ;;  %p3021_p13 = scmp.lt.s32.totalorder %s2300_s27, %s2300_s27 }
  0x5e   :  { %v2321_v12 = vpack.c.bf16 %v197_v10, %v165_v9  ;;  %v199_v13 = vld [vmem:[#allocation8 + $0x110] sm:$0xff]  ;;  %v262_v15 = vld [vmem:[#allocation8 + $0x308] sm:$0xff]  ;;  %980 = vmatprep.mubr.f32.mxu0 %v3053_v0  ;;  %v232_v18 = vld [vmem:[#allocation8 + $0x218] sm:$0xff]  ;;  %p3017_p12 = scmp.ne.s32.totalorder %s2300_s27, %s3016_s28  ;;  %p3022_p0 = scmp.lt.s32.totalorder %s3016_s28, %s3016_s28 }
  0x5f   :  { %2320 = vmatprep.subr.bf16.mxu1 %v2319_v7  ;;  %2352 = vmatprep.subr.bf16.mxu0 %v2351_v8  ;;  %v2353_v16 = vpack.c.bf16 %v199_v13, %v167_v11  ;;  %v2323_v17 = vpack.c.bf16 %v262_v15, %v230_v14  ;;  %v264_v19 = vld [vmem:[#allocation8 + $0x318] sm:$0xff]  ;;  %v229_v20 = vld [vmem:[#allocation8 + $0x200] sm:$0xff]  ;;  %v231_v23 = vld [vmem:[#allocation8 + $0x210] sm:$0xff] }
  0x60   :  { %2322 = vmatpush1.bf16.msra.mxu1 %v2321_v12  ;;  %v2355_v21 = vpack.c.bf16 %v264_v19, %v232_v18  ;;  %v261_v22 = vld [vmem:[#allocation8 + $0x300] sm:$0xff]  ;;  %v263_v24 = vld [vmem:[#allocation8 + $0x310] sm:$0xff]  ;;  %v294_v27 = vld [vmem:[#allocation8 + $0x408] sm:$0xff]  ;;  %p3023_p1 = por %p3022_p0, %p3021_p13 }
  0x61   :  { %2354 = vmatpush1.bf16.msra.mxu0 %v2353_v16  ;;  %2324 = vmatprep.subr.bf16.mxu1 %v2323_v17  ;;  %v2325_v25 = vpack.c.bf16 %v261_v22, %v229_v20  ;;  %v2357_v26 = vpack.c.bf16 %v263_v24, %v231_v23  ;;  %v326_v28 = vld [vmem:[#allocation8 + $0x508] sm:$0xff]  ;;  %v296_v29 = vld [vmem:[#allocation8 + $0x418] sm:$0xff]  ;;  %v293_v32 = vld [vmem:[#allocation8 + $0x400] sm:$0xff] }
  0x62   :  { %2356 = vmatprep.subr.bf16.mxu0 %v2355_v21  ;;  %v2327_v30 = vpack.c.bf16 %v326_v28, %v294_v27  ;;  %v328_v31 = vld [vmem:[#allocation8 + $0x518] sm:$0xff]  ;;  %v325_v33 = vld [vmem:[#allocation8 + $0x500] sm:$0xff]  ;;  %v295_v35 = vld [vmem:[#allocation8 + $0x410] sm:$0xff]  ;;  %p3024_p2 = pnand %p3023_p1, %p3017_p12 }
  0x63   :  { %v2359_v34 = vpack.c.bf16 %v328_v31, %v296_v29  ;;  %v327_v36 = vld [vmem:[#allocation8 + $0x510] sm:$0xff]  ;;  %v358_v37 = vld [vmem:[#allocation8 + $0x608] sm:$0xff]  ;;  %v2329_v38 = vpack.c.bf16 %v325_v33, %v293_v32  ;;  %v360_v40 = vld [vmem:[#allocation8 + $0x618] sm:$0xff] }
  0x64   :  { %2326 = vmatpush1.bf16.msra.mxu1 %v2325_v25  ;;  %v390_v39 = vld [vmem:[#allocation8 + $0x708] sm:$0xff]  ;;  %v392_v41 = vld [vmem:[#allocation8 + $0x718] sm:$0xff]  ;;  %v2361_v42 = vpack.c.bf16 %v327_v36, %v295_v35  ;;  %v357_v44 = vld [vmem:[#allocation8 + $0x600] sm:$0xff] }
  0x65   :  { %2358 = vmatpush1.bf16.msra.mxu0 %v2357_v26  ;;  %2328 = vmatprep.subr.bf16.mxu1 %v2327_v30  ;;  %v2331_v43 = vpack.c.bf16 %v390_v39, %v358_v37  ;;  %v389_v45 = vld [vmem:[#allocation8 + $0x700] sm:$0xff]  ;;  %v359_v46 = vld [vmem:[#allocation8 + $0x610] sm:$0xff]  ;;  %v2363_v47 = vpack.c.bf16 %v392_v41, %v360_v40  ;;  %v422_v49 = vld [vmem:[#allocation8 + $0x808] sm:$0xff] }
  0x66   :  { %2360 = vmatprep.subr.bf16.mxu0 %v2359_v34  ;;  %v391_v48 = vld [vmem:[#allocation8 + $0x710] sm:$0xff]  ;;  %v454_v50 = vld [vmem:[#allocation8 + $0x908] sm:$0xff]  ;;  %v424_v51 = vld [vmem:[#allocation8 + $0x818] sm:$0xff]  ;;  %v2333_v53 = vpack.c.bf16 %v389_v45, %v357_v44 }
  0x67   :  { %v456_v52 = vld [vmem:[#allocation8 + $0x918] sm:$0xff]  ;;  %v2365_v54 = vpack.c.bf16 %v391_v48, %v359_v46  ;;  %v2335_v55 = vpack.c.bf16 %v454_v50, %v422_v49  ;;  %v421_v56 = vld [vmem:[#allocation8 + $0x800] sm:$0xff]  ;;  %v423_v58 = vld [vmem:[#allocation8 + $0x810] sm:$0xff] }
  0x68   :  { %2330 = vmatpush1.bf16.msra.mxu1 %v2329_v38  ;;  %v453_v57 = vld [vmem:[#allocation8 + $0x900] sm:$0xff]  ;;  %v2367_v59 = vpack.c.bf16 %v456_v52, %v424_v51  ;;  %v455_v60 = vld [vmem:[#allocation8 + $0x910] sm:$0xff]  ;;  %v486_v61 = vld [vmem:[#allocation8 + $0xa08] sm:$0xff] }
  0x69   :  { %2362 = vmatpush1.bf16.msra.mxu0 %v2361_v42  ;;  %2332 = vmatprep.subr.bf16.mxu1 %v2331_v43  ;;  %v518_v62 = vld [vmem:[#allocation8 + $0xb08] sm:$0xff]  ;;  %v488_v63 = vld [vmem:[#allocation8 + $0xa18] sm:$0xff]  ;;  %v2337_v2 = vpack.c.bf16 %v453_v57, %v421_v56  ;;  %v2369_v3 = vpack.c.bf16 %v455_v60, %v423_v58  ;;  %v485_v5 = vld [vmem:[#allocation8 + $0xa00] sm:$0xff] }
  0x6a   :  { %2364 = vmatprep.subr.bf16.mxu0 %v2363_v47  ;;  %v520_v1 = vld [vmem:[#allocation8 + $0xb18] sm:$0xff]  ;;  %v2339_v4 = vpack.c.bf16 %v518_v62, %v486_v61  ;;  %v517_v6 = vld [vmem:[#allocation8 + $0xb00] sm:$0xff]  ;;  %v487_v7 = vld [vmem:[#allocation8 + $0xa10] sm:$0xff] }
  0x6b   :  { %v2371_v8 = vpack.c.bf16 %v520_v1, %v488_v63  ;;  %v519_v9 = vld [vmem:[#allocation8 + $0xb10] sm:$0xff]  ;;  %v550_v10 = vld [vmem:[#allocation8 + $0xc08] sm:$0xff]  ;;  %v552_v12 = vld [vmem:[#allocation8 + $0xc18] sm:$0xff]  ;;  %v2341_v14 = vpack.c.bf16 %v517_v6, %v485_v5 }
  0x6c   :  { %2334 = vmatpush1.bf16.msra.mxu1 %v2333_v53  ;;  %v582_v11 = vld [vmem:[#allocation8 + $0xd08] sm:$0xff]  ;;  %v584_v13 = vld [vmem:[#allocation8 + $0xd18] sm:$0xff]  ;;  %v2373_v15 = vpack.c.bf16 %v519_v9, %v487_v7  ;;  %v549_v17 = vld [vmem:[#allocation8 + $0xc00] sm:$0xff] }
  0x6d   :  { %2366 = vmatpush1.bf16.msra.mxu0 %v2365_v54  ;;  %2336 = vmatprep.subr.bf16.mxu1 %v2335_v55  ;;  %v2343_v16 = vpack.c.bf16 %v582_v11, %v550_v10  ;;  %v581_v18 = vld [vmem:[#allocation8 + $0xd00] sm:$0xff]  ;;  %v2375_v19 = vpack.c.bf16 %v584_v13, %v552_v12  ;;  %v551_v20 = vld [vmem:[#allocation8 + $0xc10] sm:$0xff]  ;;  %v614_v24 = vld [vmem:[#allocation8 + $0xe08] sm:$0xff] }
  0x6e   :  { %2368 = vmatprep.subr.bf16.mxu0 %v2367_v59  ;;  %v583_v21 = vld [vmem:[#allocation8 + $0xd10] sm:$0xff]  ;;  %v2345_v22 = vpack.c.bf16 %v581_v18, %v549_v17  ;;  %v646_v25 = vld [vmem:[#allocation8 + $0xf08] sm:$0xff]  ;;  %v616_v26 = vld [vmem:[#allocation8 + $0xe18] sm:$0xff] }
  0x6f   :  { %v2377_v23 = vpack.c.bf16 %v583_v21, %v551_v20  ;;  %v2347_v27 = vpack.c.bf16 %v646_v25, %v614_v24  ;;  %v648_v28 = vld [vmem:[#allocation8 + $0xf18] sm:$0xff]  ;;  %v613_v29 = vld [vmem:[#allocation8 + $0xe00] sm:$0xff]  ;;  %v615_v33 = vld [vmem:[#allocation8 + $0xe10] sm:$0xff] }
  0x70   :  { %2338 = vmatpush1.bf16.msra.mxu1 %v2337_v2  ;;  %v645_v30 = vld [vmem:[#allocation8 + $0xf00] sm:$0xff]  ;;  %v2379_v31 = vpack.c.bf16 %v648_v28, %v616_v26  ;;  %v647_v34 = vld [vmem:[#allocation8 + $0xf10] sm:$0xff]  ;;  %v170_v36 = vld [vmem:[#allocation8 + $0x28] sm:$0xff] }
  0x71   :  { %2370 = vmatpush1.bf16.msra.mxu0 %v2369_v3  ;;  %2340 = vmatprep.subr.bf16.mxu1 %v2339_v4  ;;  %v2349_v32 = vpack.c.bf16 %v645_v30, %v613_v29  ;;  %v2381_v35 = vpack.c.bf16 %v647_v34, %v615_v33  ;;  %v202_v37 = vld [vmem:[#allocation8 + $0x128] sm:$0xff]  ;;  %v172_v38 = vld [vmem:[#allocation8 + $0x38] sm:$0xff]  ;;  %v169_v43 = vld [vmem:[#allocation8 + $0x20] sm:$0xff] }
  0x72   :  { %2372 = vmatprep.subr.bf16.mxu0 %v2371_v8  ;;  %v2383_v39 = vpack.c.bf16 %v202_v37, %v170_v36  ;;  %v204_v40 = vld [vmem:[#allocation8 + $0x138] sm:$0xff]  ;;  %v201_v44 = vld [vmem:[#allocation8 + $0x120] sm:$0xff]  ;;  %v171_v45 = vld [vmem:[#allocation8 + $0x30] sm:$0xff] }
  0x73   :  { %v2415_v41 = vpack.c.bf16 %v204_v40, %v172_v38  ;;  %v2310_v42 = vld [vmem:[#allocation7] ss:$0 sm:$0xff]  ;;  %v203_v46 = vld [vmem:[#allocation8 + $0x130] sm:$0xff]  ;;  %v234_v47 = vld [vmem:[#allocation8 + $0x228] sm:$0xff]  ;;  %v2385_v54 = vpack.c.bf16 %v201_v44, %v169_v43 }
  0x74   :  { %2342 = vmatpush1.bf16.msra.mxu1 %v2341_v14  ;;  %v266_v49 = vld [vmem:[#allocation8 + $0x328] sm:$0xff]  ;;  %v236_v50 = vld [vmem:[#allocation8 + $0x238] sm:$0xff]  ;;  %v2417_v55 = vpack.c.bf16 %v203_v46, %v171_v45  ;;  %v233_v56 = vld [vmem:[#allocation8 + $0x220] sm:$0xff] }
  0x75   :  { %2374 = vmatpush1.bf16.msra.mxu0 %v2373_v15  ;;  %2344 = vmatprep.subr.bf16.mxu1 %v2343_v16  ;;  %v268_v51 = vld [vmem:[#allocation8 + $0x338] sm:$0xff]  ;;  %v265_v57 = vld [vmem:[#allocation8 + $0x320] sm:$0xff]  ;;  %v2387_v59 = vpack.c.bf16 %v266_v49, %v234_v47  ;;  %v235_v61 = vld [vmem:[#allocation8 + $0x230] sm:$0xff] }
  0x76   :  { %2376 = vmatprep.subr.bf16.mxu0 %v2375_v19  ;;  %v2419_v60 = vpack.c.bf16 %v268_v51, %v236_v50  ;;  %v267_v62 = vld [vmem:[#allocation8 + $0x330] sm:$0xff]  ;;  %v298_v63 = vld [vmem:[#allocation8 + $0x428] sm:$0xff]  ;;  %v300_v2 = vld [vmem:[#allocation8 + $0x438] sm:$0xff]  ;;  %v2389_v4 = vpack.c.bf16 %v265_v57, %v233_v56 }
  0x77   :  { %v330_v1 = vld [vmem:[#allocation8 + $0x528] sm:$0xff]  ;;  %v332_v3 = vld [vmem:[#allocation8 + $0x538] sm:$0xff]  ;;  %v2421_v5 = vpack.c.bf16 %v267_v62, %v235_v61  ;;  %v297_v6 = vld [vmem:[#allocation8 + $0x420] sm:$0xff] }
  0x78   :  { %2346 = vmatpush1.bf16.msra.mxu1 %v2345_v22  ;;  %v329_v7 = vld [vmem:[#allocation8 + $0x520] sm:$0xff]  ;;  %v2391_v8 = vpack.c.bf16 %v330_v1, %v298_v63  ;;  %v2423_v9 = vpack.c.bf16 %v332_v3, %v300_v2  ;;  %v299_v10 = vld [vmem:[#allocation8 + $0x430] sm:$0xff]  ;;  %v362_v12 = vld [vmem:[#allocation8 + $0x628] sm:$0xff] }
  0x79   :  { %2378 = vmatpush1.bf16.msra.mxu0 %v2377_v23  ;;  %2348 = vmatprep.subr.bf16.mxu1 %v2347_v27  ;;  %v331_v11 = vld [vmem:[#allocation8 + $0x530] sm:$0xff]  ;;  %v394_v13 = vld [vmem:[#allocation8 + $0x728] sm:$0xff]  ;;  %v364_v14 = vld [vmem:[#allocation8 + $0x638] sm:$0xff]  ;;  %v2393_v16 = vpack.c.bf16 %v329_v7, %v297_v6 }
  0x7a   :  { %2380 = vmatprep.subr.bf16.mxu0 %v2379_v31  ;;  %v396_v15 = vld [vmem:[#allocation8 + $0x738] sm:$0xff]  ;;  %v2425_v17 = vpack.c.bf16 %v331_v11, %v299_v10  ;;  %v361_v18 = vld [vmem:[#allocation8 + $0x620] sm:$0xff]  ;;  %v2395_v20 = vpack.c.bf16 %v394_v13, %v362_v12  ;;  %v363_v22 = vld [vmem:[#allocation8 + $0x630] sm:$0xff] }
  0x7b   :  { %v393_v19 = vld [vmem:[#allocation8 + $0x720] sm:$0xff]  ;;  %v2427_v21 = vpack.c.bf16 %v396_v15, %v364_v14  ;;  %v395_v23 = vld [vmem:[#allocation8 + $0x730] sm:$0xff]  ;;  %v426_v24 = vld [vmem:[#allocation8 + $0x828] sm:$0xff] }
  0x7c   :  { %2350 = vmatpush1.bf16.msra.mxu1 %v2349_v32  ;;  %v458_v25 = vld [vmem:[#allocation8 + $0x928] sm:$0xff]  ;;  %v428_v26 = vld [vmem:[#allocation8 + $0x838] sm:$0xff]  ;;  %v2397_v28 = vpack.c.bf16 %v393_v19, %v361_v18  ;;  %v2429_v29 = vpack.c.bf16 %v395_v23, %v363_v22  ;;  %v425_v30 = vld [vmem:[#allocation8 + $0x820] sm:$0xff] }
  0x7d   :  { %2382 = vmatpush1.bf16.msra.mxu0 %v2381_v35  ;;  %2384 = vmatprep.subr.bf16.mxu1 %v2383_v39  ;;  %v460_v27 = vld [vmem:[#allocation8 + $0x938] sm:$0xff]  ;;  %v457_v31 = vld [vmem:[#allocation8 + $0x920] sm:$0xff]  ;;  %v2399_v32 = vpack.c.bf16 %v458_v25, %v426_v24  ;;  %v427_v34 = vld [vmem:[#allocation8 + $0x830] sm:$0xff] }
  0x7e   :  { %2416 = vmatprep.subr.bf16.mxu0 %v2415_v41  ;;  %v2431_v33 = vpack.c.bf16 %v460_v27, %v428_v26  ;;  %v459_v35 = vld [vmem:[#allocation8 + $0x930] sm:$0xff]  ;;  %v490_v36 = vld [vmem:[#allocation8 + $0xa28] sm:$0xff]  ;;  %v492_v38 = vld [vmem:[#allocation8 + $0xa38] sm:$0xff]  ;;  %v2401_v40 = vpack.c.bf16 %v457_v31, %v425_v30 }
  0x7f   :  { %v522_v37 = vld [vmem:[#allocation8 + $0xb28] sm:$0xff]  ;;  %v524_v39 = vld [vmem:[#allocation8 + $0xb38] sm:$0xff]  ;;  %v2433_v41 = vpack.c.bf16 %v459_v35, %v427_v34  ;;  %v521_v43 = vld [vmem:[#allocation8 + $0xb20] sm:$0xff] }
  0x80   :  { %v2403_v44 = vpack.c.bf16 %v522_v37, %v490_v36  ;;  %v2435_v45 = vpack.c.bf16 %v524_v39, %v492_v38  ;;  %v491_v46 = vld [vmem:[#allocation8 + $0xa30] sm:$0xff]  ;;  %v586_v49 = vld [vmem:[#allocation8 + $0xd28] sm:$0xff]  ;;  %v556_v50 = vld [vmem:[#allocation8 + $0xc38] sm:$0xff] }
  0x81   :  { %v523_v47 = vld [vmem:[#allocation8 + $0xb30] sm:$0xff]  ;;  %v588_v51 = vld [vmem:[#allocation8 + $0xd38] sm:$0xff]  ;;  %v618_v61 = vld [vmem:[#allocation8 + $0xe28] sm:$0xff] }
  0x82   :  { %v2439_v57 = vpack.c.bf16 %v588_v51, %v556_v50  ;;  %v650_v62 = vld [vmem:[#allocation8 + $0xf28] sm:$0xff]  ;;  %v620_v63 = vld [vmem:[#allocation8 + $0xe38] sm:$0xff] }
  0x83   :  { %v652_v1 = vld [vmem:[#allocation8 + $0xf38] sm:$0xff]  ;;  %v2411_v6 = vpack.c.bf16 %v650_v62, %v618_v61  ;;  %v174_v10 = vld [vmem:[#allocation8 + $0x48] sm:$0xff] }
  0x84   :  { %v2443_v7 = vpack.c.bf16 %v652_v1, %v620_v63  ;;  %v206_v11 = vld [vmem:[#allocation8 + $0x148] sm:$0xff]  ;;  %v176_v12 = vld [vmem:[#allocation8 + $0x58] sm:$0xff] }
  0x85   :  { %v208_v13 = vld [vmem:[#allocation8 + $0x158] sm:$0xff]  ;;  %v2447_v18 = vpack.c.bf16 %v206_v11, %v174_v10  ;;  %v238_v22 = vld [vmem:[#allocation8 + $0x248] sm:$0xff] }
  0x86   :  { %v2479_v19 = vpack.c.bf16 %v208_v13, %v176_v12  ;;  %v270_v23 = vld [vmem:[#allocation8 + $0x348] sm:$0xff]  ;;  %v240_v24 = vld [vmem:[#allocation8 + $0x258] sm:$0xff] }
  0x87   :  { %v272_v25 = vld [vmem:[#allocation8 + $0x358] sm:$0xff]  ;;  %v2451_v30 = vpack.c.bf16 %v270_v23, %v238_v22  ;;  %v302_v34 = vld [vmem:[#allocation8 + $0x448] sm:$0xff] }
  0x88   :  { %v2483_v31 = vpack.c.bf16 %v272_v25, %v240_v24  ;;  %v334_v35 = vld [vmem:[#allocation8 + $0x548] sm:$0xff]  ;;  %v304_v36 = vld [vmem:[#allocation8 + $0x458] sm:$0xff] }
  0x89   :  { %v336_v37 = vld [vmem:[#allocation8 + $0x558] sm:$0xff] }
  0x8a   :  { %v432_v61 = vld [vmem:[#allocation8 + $0x858] sm:$0xff] }
  0x8b   :  { %v464_v62 = vld [vmem:[#allocation8 + $0x958] sm:$0xff] }
  0x8c   :  { %v496_v10 = vld [vmem:[#allocation8 + $0xa58] sm:$0xff] }
  0x8d   :  { %v528_v11 = vld [vmem:[#allocation8 + $0xb58] sm:$0xff] }
  0x8e   :  { %v560_v22 = vld [vmem:[#allocation8 + $0xc58] sm:$0xff] }
  0x8f   :  { %v592_v23 = vld [vmem:[#allocation8 + $0xd58] sm:$0xff] }
 0x130   :  { %v160_v48 = vpop.f32.mrb[0].mxu0 }
 0x131   :  { %v161_v52 = vadd.f32 %v2310_v42, %v160_v48  ;;  %v2318_v53 = vpop.f32.mrb[1].mxu0  ;;  %v489_v42 = vld [vmem:[#allocation8 + $0xa20] sm:$0xff]  ;;  %v554_v48 = vld [vmem:[#allocation8 + $0xc28] sm:$0xff] }
 0x132   :  { %v2437_v53 = vpack.c.bf16 %v523_v47, %v491_v46  ;;  %v2407_v56 = vpack.c.bf16 %v586_v49, %v554_v48  ;;  %v366_v46 = vld [vmem:[#allocation8 + $0x648] sm:$0xff]  ;;  %v368_v48 = vld [vmem:[#allocation8 + $0x658] sm:$0xff] }
 0x133   :  { %v3158_v58 = vmax.f32 %v161_v52, 0.0  ;;  %v2405_v52 = vpack.c.bf16 %v521_v43, %v489_v42  ;;  %v2455_v42 = vpack.c.bf16 %v334_v35, %v302_v34  ;;  %v2487_v43 = vpack.c.bf16 %v336_v37, %v304_v36  ;;  %v398_v47 = vld [vmem:[#allocation8 + $0x748] sm:$0xff]  ;;  %v400_v49 = vld [vmem:[#allocation8 + $0x758] sm:$0xff] }
 0x134   :  { %v624_v34 = vld [vmem:[#allocation8 + $0xe58] sm:$0xff] }
 0x135   :  { %910 = vmatmul.mubr.f32.vlgmr.msra.gmra.mrb[0].mxu1 %v3158_v58  ;;  %981 = vmatmul.mubr.f32.vlgmr.msra.gmra.mrb[2].mxu0 %v3158_v58  ;;  %v656_v35 = vld [vmem:[#allocation8 + $0xf58] sm:$0xff] }
 0x136   :  { %2386 = vmatpush1.bf16.msra.mxu1 %v2385_v54  ;;  %2418 = vmatpush1.bf16.msra.mxu0 %v2417_v55  ;;  %v553_v54 = vld [vmem:[#allocation8 + $0xc20] sm:$0xff] }
 0x137   :  { %2388 = vmatprep.subr.bf16.mxu1 %v2387_v59  ;;  %2420 = vmatprep.subr.bf16.mxu0 %v2419_v60  ;;  %v585_v55 = vld [vmem:[#allocation8 + $0xd20] sm:$0xff]  ;;  %v555_v59 = vld [vmem:[#allocation8 + $0xc30] sm:$0xff] }
 0x138   :  { %1051 = vmatprep.mubr.f32.mxu1 %v3053_v0  ;;  %1122 = vmatprep.mubr.f32.mxu0 %v3053_v0  ;;  %v587_v60 = vld [vmem:[#allocation8 + $0xd30] sm:$0xff]  ;;  %v2409_v2 = vpack.c.bf16 %v585_v55, %v553_v54  ;;  %v2459_v54 = vpack.c.bf16 %v398_v47, %v366_v46  ;;  %v2491_v55 = vpack.c.bf16 %v400_v49, %v368_v48  ;;  %v180_v46 = vld [vmem:[#allocation8 + $0x78] sm:$0xff] }
 0x139   :  { %v2441_v3 = vpack.c.bf16 %v587_v60, %v555_v59  ;;  %v430_v59 = vld [vmem:[#allocation8 + $0x848] sm:$0xff]  ;;  %v212_v47 = vld [vmem:[#allocation8 + $0x178] sm:$0xff] }
 0x13a   :  { %2390 = vmatpush1.bf16.msra.mxu1 %v2389_v4  ;;  %2422 = vmatpush1.bf16.msra.mxu0 %v2421_v5  ;;  %v617_v4 = vld [vmem:[#allocation8 + $0xe20] sm:$0xff]  ;;  %v462_v60 = vld [vmem:[#allocation8 + $0x948] sm:$0xff] }
 0x13b   :  { %2392 = vmatprep.subr.bf16.mxu1 %v2391_v8  ;;  %2424 = vmatprep.subr.bf16.mxu0 %v2423_v9  ;;  %v649_v5 = vld [vmem:[#allocation8 + $0xf20] sm:$0xff]  ;;  %v619_v8 = vld [vmem:[#allocation8 + $0xe30] sm:$0xff] }
 0x13c   :  { %v651_v9 = vld [vmem:[#allocation8 + $0xf30] sm:$0xff]  ;;  %v2413_v14 = vpack.c.bf16 %v649_v5, %v617_v4  ;;  %v2463_v4 = vpack.c.bf16 %v462_v60, %v430_v59  ;;  %v2495_v5 = vpack.c.bf16 %v464_v62, %v432_v61  ;;  %v244_v59 = vld [vmem:[#allocation8 + $0x278] sm:$0xff] }
 0x13d   :  { %v2445_v15 = vpack.c.bf16 %v651_v9, %v619_v8  ;;  %v494_v8 = vld [vmem:[#allocation8 + $0xa48] sm:$0xff]  ;;  %v276_v60 = vld [vmem:[#allocation8 + $0x378] sm:$0xff] }
 0x13e   :  { %2394 = vmatpush1.bf16.msra.mxu1 %v2393_v16  ;;  %2426 = vmatpush1.bf16.msra.mxu0 %v2425_v17  ;;  %v173_v16 = vld [vmem:[#allocation8 + $0x40] sm:$0xff]  ;;  %v526_v9 = vld [vmem:[#allocation8 + $0xb48] sm:$0xff] }
 0x13f   :  { %2396 = vmatprep.subr.bf16.mxu1 %v2395_v20  ;;  %2428 = vmatprep.subr.bf16.mxu0 %v2427_v21  ;;  %v205_v17 = vld [vmem:[#allocation8 + $0x140] sm:$0xff]  ;;  %v175_v20 = vld [vmem:[#allocation8 + $0x50] sm:$0xff] }
 0x140   :  { %v207_v21 = vld [vmem:[#allocation8 + $0x150] sm:$0xff]  ;;  %v2449_v26 = vpack.c.bf16 %v205_v17, %v173_v16  ;;  %v2467_v16 = vpack.c.bf16 %v526_v9, %v494_v8  ;;  %v2499_v17 = vpack.c.bf16 %v528_v11, %v496_v10  ;;  %v308_v8 = vld [vmem:[#allocation8 + $0x478] sm:$0xff] }
 0x141   :  { %v2481_v27 = vpack.c.bf16 %v207_v21, %v175_v20  ;;  %v558_v20 = vld [vmem:[#allocation8 + $0xc48] sm:$0xff]  ;;  %v340_v9 = vld [vmem:[#allocation8 + $0x578] sm:$0xff] }
 0x142   :  { %2398 = vmatpush1.bf16.msra.mxu1 %v2397_v28  ;;  %2430 = vmatpush1.bf16.msra.mxu0 %v2429_v29  ;;  %v237_v28 = vld [vmem:[#allocation8 + $0x240] sm:$0xff]  ;;  %v590_v21 = vld [vmem:[#allocation8 + $0xd48] sm:$0xff] }
 0x143   :  { %2400 = vmatprep.subr.bf16.mxu1 %v2399_v32  ;;  %2432 = vmatprep.subr.bf16.mxu0 %v2431_v33  ;;  %v269_v29 = vld [vmem:[#allocation8 + $0x340] sm:$0xff]  ;;  %v239_v32 = vld [vmem:[#allocation8 + $0x250] sm:$0xff] }
 0x144   :  { %v271_v33 = vld [vmem:[#allocation8 + $0x350] sm:$0xff]  ;;  %v2453_v38 = vpack.c.bf16 %v269_v29, %v237_v28  ;;  %v2471_v28 = vpack.c.bf16 %v590_v21, %v558_v20  ;;  %v2503_v29 = vpack.c.bf16 %v592_v23, %v560_v22  ;;  %v372_v20 = vld [vmem:[#allocation8 + $0x678] sm:$0xff] }
 0x145   :  { %v2485_v39 = vpack.c.bf16 %v271_v33, %v239_v32  ;;  %v622_v32 = vld [vmem:[#allocation8 + $0xe48] sm:$0xff]  ;;  %v404_v21 = vld [vmem:[#allocation8 + $0x778] sm:$0xff] }
 0x146   :  { %2402 = vmatpush1.bf16.msra.mxu1 %v2401_v40  ;;  %2434 = vmatpush1.bf16.msra.mxu0 %v2433_v41  ;;  %v301_v40 = vld [vmem:[#allocation8 + $0x440] sm:$0xff]  ;;  %v654_v33 = vld [vmem:[#allocation8 + $0xf48] sm:$0xff] }
 0x147   :  { %2404 = vmatprep.subr.bf16.mxu1 %v2403_v44  ;;  %2436 = vmatprep.subr.bf16.mxu0 %v2435_v45  ;;  %v333_v41 = vld [vmem:[#allocation8 + $0x540] sm:$0xff]  ;;  %v303_v44 = vld [vmem:[#allocation8 + $0x450] sm:$0xff] }
 0x148   :  { %v335_v45 = vld [vmem:[#allocation8 + $0x550] sm:$0xff]  ;;  %v2457_v50 = vpack.c.bf16 %v333_v41, %v301_v40  ;;  %v2475_v40 = vpack.c.bf16 %v654_v33, %v622_v32  ;;  %v2507_v41 = vpack.c.bf16 %v656_v35, %v624_v34  ;;  %v436_v32 = vld [vmem:[#allocation8 + $0x878] sm:$0xff] }
 0x149   :  { %v2489_v51 = vpack.c.bf16 %v335_v45, %v303_v44  ;;  %v178_v44 = vld [vmem:[#allocation8 + $0x68] sm:$0xff]  ;;  %v468_v33 = vld [vmem:[#allocation8 + $0x978] sm:$0xff] }
 0x14a   :  { %2406 = vmatpush1.bf16.msra.mxu1 %v2405_v52  ;;  %2438 = vmatpush1.bf16.msra.mxu0 %v2437_v53  ;;  %v365_v52 = vld [vmem:[#allocation8 + $0x640] sm:$0xff]  ;;  %v210_v45 = vld [vmem:[#allocation8 + $0x168] sm:$0xff] }
 0x14b   :  { %2408 = vmatprep.subr.bf16.mxu1 %v2407_v56  ;;  %2440 = vmatprep.subr.bf16.mxu0 %v2439_v57  ;;  %v397_v53 = vld [vmem:[#allocation8 + $0x740] sm:$0xff]  ;;  %v367_v56 = vld [vmem:[#allocation8 + $0x650] sm:$0xff] }
 0x14c   :  { %v399_v57 = vld [vmem:[#allocation8 + $0x750] sm:$0xff]  ;;  %v2461_v63 = vpack.c.bf16 %v397_v53, %v365_v52  ;;  %v2511_v52 = vpack.c.bf16 %v210_v45, %v178_v44  ;;  %v2543_v53 = vpack.c.bf16 %v212_v47, %v180_v46  ;;  %v500_v44 = vld [vmem:[#allocation8 + $0xa78] sm:$0xff] }
 0x14d   :  { %v2493_v1 = vpack.c.bf16 %v399_v57, %v367_v56  ;;  %v242_v56 = vld [vmem:[#allocation8 + $0x268] sm:$0xff]  ;;  %v532_v45 = vld [vmem:[#allocation8 + $0xb78] sm:$0xff] }
 0x14e   :  { %2410 = vmatpush1.bf16.msra.mxu1 %v2409_v2  ;;  %2442 = vmatpush1.bf16.msra.mxu0 %v2441_v3  ;;  %v429_v2 = vld [vmem:[#allocation8 + $0x840] sm:$0xff]  ;;  %v274_v57 = vld [vmem:[#allocation8 + $0x368] sm:$0xff] }
 0x14f   :  { %2412 = vmatprep.subr.bf16.mxu1 %v2411_v6  ;;  %2444 = vmatprep.subr.bf16.mxu0 %v2443_v7  ;;  %v461_v3 = vld [vmem:[#allocation8 + $0x940] sm:$0xff]  ;;  %v431_v6 = vld [vmem:[#allocation8 + $0x850] sm:$0xff] }
 0x150   :  { %v463_v7 = vld [vmem:[#allocation8 + $0x950] sm:$0xff]  ;;  %v2465_v12 = vpack.c.bf16 %v461_v3, %v429_v2  ;;  %v2515_v2 = vpack.c.bf16 %v274_v57, %v242_v56  ;;  %v2547_v3 = vpack.c.bf16 %v276_v60, %v244_v59  ;;  %v564_v56 = vld [vmem:[#allocation8 + $0xc78] sm:$0xff] }
 0x151   :  { %v2497_v13 = vpack.c.bf16 %v463_v7, %v431_v6  ;;  %v306_v6 = vld [vmem:[#allocation8 + $0x468] sm:$0xff]  ;;  %v596_v57 = vld [vmem:[#allocation8 + $0xd78] sm:$0xff] }
 0x152   :  { %2414 = vmatpush1.bf16.msra.mxu1 %v2413_v14  ;;  %2446 = vmatpush1.bf16.msra.mxu0 %v2445_v15  ;;  %v493_v14 = vld [vmem:[#allocation8 + $0xa40] sm:$0xff]  ;;  %v338_v7 = vld [vmem:[#allocation8 + $0x568] sm:$0xff] }
 0x153   :  { %2448 = vmatprep.subr.bf16.mxu1 %v2447_v18  ;;  %2480 = vmatprep.subr.bf16.mxu0 %v2479_v19  ;;  %v525_v15 = vld [vmem:[#allocation8 + $0xb40] sm:$0xff]  ;;  %v495_v18 = vld [vmem:[#allocation8 + $0xa50] sm:$0xff] }
 0x154   :  { %v527_v19 = vld [vmem:[#allocation8 + $0xb50] sm:$0xff]  ;;  %v2469_v24 = vpack.c.bf16 %v525_v15, %v493_v14  ;;  %v2519_v14 = vpack.c.bf16 %v338_v7, %v306_v6  ;;  %v2551_v15 = vpack.c.bf16 %v340_v9, %v308_v8  ;;  %v628_v6 = vld [vmem:[#allocation8 + $0xe78] sm:$0xff] }
 0x155   :  { %1052 = vmatmul.mubr.f32.vlgmr.msra.gmra.mrb[2].mxu1 %v3158_v58  ;;  %1123 = vmatmul.mubr.f32.vlgmr.msra.gmra.mrb[4].mxu0 %v3158_v58  ;;  %v2501_v25 = vpack.c.bf16 %v527_v19, %v495_v18  ;;  %v370_v18 = vld [vmem:[#allocation8 + $0x668] sm:$0xff]  ;;  %v660_v7 = vld [vmem:[#allocation8 + $0xf78] sm:$0xff] }
 0x156   :  { %2450 = vmatpush1.bf16.msra.mxu1 %v2449_v26  ;;  %2482 = vmatpush1.bf16.msra.mxu0 %v2481_v27  ;;  %v557_v26 = vld [vmem:[#allocation8 + $0xc40] sm:$0xff]  ;;  %v402_v19 = vld [vmem:[#allocation8 + $0x768] sm:$0xff] }
 0x157   :  { %2452 = vmatprep.subr.bf16.mxu1 %v2451_v30  ;;  %2484 = vmatprep.subr.bf16.mxu0 %v2483_v31  ;;  %v589_v27 = vld [vmem:[#allocation8 + $0xd40] sm:$0xff]  ;;  %v559_v30 = vld [vmem:[#allocation8 + $0xc50] sm:$0xff] }
 0x158   :  { %1193 = vmatprep.mubr.f32.mxu1 %v3053_v0  ;;  %1264 = vmatprep.mubr.f32.mxu0 %v3053_v0  ;;  %v591_v31 = vld [vmem:[#allocation8 + $0xd50] sm:$0xff]  ;;  %v2473_v36 = vpack.c.bf16 %v589_v27, %v557_v26  ;;  %v2523_v26 = vpack.c.bf16 %v402_v19, %v370_v18  ;;  %v2555_v27 = vpack.c.bf16 %v404_v21, %v372_v20  ;;  %v184_v18 = vld [vmem:[#allocation8 + $0x98] sm:$0xff] }
 0x159   :  { %v2505_v37 = vpack.c.bf16 %v591_v31, %v559_v30  ;;  %v434_v30 = vld [vmem:[#allocation8 + $0x868] sm:$0xff]  ;;  %v216_v19 = vld [vmem:[#allocation8 + $0x198] sm:$0xff] }
 0x15a   :  { %2454 = vmatpush1.bf16.msra.mxu1 %v2453_v38  ;;  %2486 = vmatpush1.bf16.msra.mxu0 %v2485_v39  ;;  %v621_v38 = vld [vmem:[#allocation8 + $0xe40] sm:$0xff]  ;;  %v466_v31 = vld [vmem:[#allocation8 + $0x968] sm:$0xff] }
 0x15b   :  { %2456 = vmatprep.subr.bf16.mxu1 %v2455_v42  ;;  %2488 = vmatprep.subr.bf16.mxu0 %v2487_v43  ;;  %v653_v39 = vld [vmem:[#allocation8 + $0xf40] sm:$0xff]  ;;  %v623_v42 = vld [vmem:[#allocation8 + $0xe50] sm:$0xff] }
 0x15c   :  { %v655_v43 = vld [vmem:[#allocation8 + $0xf50] sm:$0xff]  ;;  %v2477_v48 = vpack.c.bf16 %v653_v39, %v621_v38  ;;  %v2527_v38 = vpack.c.bf16 %v466_v31, %v434_v30  ;;  %v2559_v39 = vpack.c.bf16 %v468_v33, %v436_v32  ;;  %v248_v30 = vld [vmem:[#allocation8 + $0x298] sm:$0xff] }
 0x15d   :  { %v2509_v49 = vpack.c.bf16 %v655_v43, %v623_v42  ;;  %v498_v42 = vld [vmem:[#allocation8 + $0xa68] sm:$0xff]  ;;  %v280_v31 = vld [vmem:[#allocation8 + $0x398] sm:$0xff] }
 0x15e   :  { %2458 = vmatpush1.bf16.msra.mxu1 %v2457_v50  ;;  %2490 = vmatpush1.bf16.msra.mxu0 %v2489_v51  ;;  %v177_v50 = vld [vmem:[#allocation8 + $0x60] sm:$0xff]  ;;  %v530_v43 = vld [vmem:[#allocation8 + $0xb68] sm:$0xff] }
 0x15f   :  { %2460 = vmatprep.subr.bf16.mxu1 %v2459_v54  ;;  %2492 = vmatprep.subr.bf16.mxu0 %v2491_v55  ;;  %v209_v51 = vld [vmem:[#allocation8 + $0x160] sm:$0xff]  ;;  %v179_v54 = vld [vmem:[#allocation8 + $0x70] sm:$0xff] }
 0x160   :  { %v211_v55 = vld [vmem:[#allocation8 + $0x170] sm:$0xff]  ;;  %v2513_v61 = vpack.c.bf16 %v209_v51, %v177_v50  ;;  %v2531_v50 = vpack.c.bf16 %v530_v43, %v498_v42  ;;  %v2563_v51 = vpack.c.bf16 %v532_v45, %v500_v44  ;;  %v312_v42 = vld [vmem:[#allocation8 + $0x498] sm:$0xff] }
 0x161   :  { %v2545_v62 = vpack.c.bf16 %v211_v55, %v179_v54  ;;  %v562_v54 = vld [vmem:[#allocation8 + $0xc68] sm:$0xff]  ;;  %v344_v43 = vld [vmem:[#allocation8 + $0x598] sm:$0xff] }
 0x162   :  { %2462 = vmatpush1.bf16.msra.mxu1 %v2461_v63  ;;  %2494 = vmatpush1.bf16.msra.mxu0 %v2493_v1  ;;  %v241_v63 = vld [vmem:[#allocation8 + $0x260] sm:$0xff]  ;;  %v594_v55 = vld [vmem:[#allocation8 + $0xd68] sm:$0xff] }
 0x163   :  { %2464 = vmatprep.subr.bf16.mxu1 %v2463_v4  ;;  %2496 = vmatprep.subr.bf16.mxu0 %v2495_v5  ;;  %v273_v1 = vld [vmem:[#allocation8 + $0x360] sm:$0xff]  ;;  %v243_v4 = vld [vmem:[#allocation8 + $0x270] sm:$0xff] }
 0x164   :  { %v275_v5 = vld [vmem:[#allocation8 + $0x370] sm:$0xff]  ;;  %v2517_v10 = vpack.c.bf16 %v273_v1, %v241_v63  ;;  %v2535_v63 = vpack.c.bf16 %v594_v55, %v562_v54  ;;  %v2567_v1 = vpack.c.bf16 %v596_v57, %v564_v56  ;;  %v376_v54 = vld [vmem:[#allocation8 + $0x698] sm:$0xff] }
 0x165   :  { %v2549_v11 = vpack.c.bf16 %v275_v5, %v243_v4  ;;  %v626_v4 = vld [vmem:[#allocation8 + $0xe68] sm:$0xff]  ;;  %v408_v55 = vld [vmem:[#allocation8 + $0x798] sm:$0xff] }
 0x166   :  { %2466 = vmatpush1.bf16.msra.mxu1 %v2465_v12  ;;  %2498 = vmatpush1.bf16.msra.mxu0 %v2497_v13  ;;  %v305_v12 = vld [vmem:[#allocation8 + $0x460] sm:$0xff]  ;;  %v658_v5 = vld [vmem:[#allocation8 + $0xf68] sm:$0xff] }
 0x167   :  { %2468 = vmatprep.subr.bf16.mxu1 %v2467_v16  ;;  %2500 = vmatprep.subr.bf16.mxu0 %v2499_v17  ;;  %v337_v13 = vld [vmem:[#allocation8 + $0x560] sm:$0xff]  ;;  %v307_v16 = vld [vmem:[#allocation8 + $0x470] sm:$0xff] }
 0x168   :  { %v339_v17 = vld [vmem:[#allocation8 + $0x570] sm:$0xff]  ;;  %v2521_v22 = vpack.c.bf16 %v337_v13, %v305_v12  ;;  %v2539_v12 = vpack.c.bf16 %v658_v5, %v626_v4  ;;  %v2571_v13 = vpack.c.bf16 %v660_v7, %v628_v6  ;;  %v440_v4 = vld [vmem:[#allocation8 + $0x898] sm:$0xff] }
 0x169   :  { %v2553_v23 = vpack.c.bf16 %v339_v17, %v307_v16  ;;  %v182_v16 = vld [vmem:[#allocation8 + $0x88] sm:$0xff]  ;;  %v472_v5 = vld [vmem:[#allocation8 + $0x998] sm:$0xff] }
 0x16a   :  { %2470 = vmatpush1.bf16.msra.mxu1 %v2469_v24  ;;  %2502 = vmatpush1.bf16.msra.mxu0 %v2501_v25  ;;  %v369_v24 = vld [vmem:[#allocation8 + $0x660] sm:$0xff]  ;;  %v214_v17 = vld [vmem:[#allocation8 + $0x188] sm:$0xff] }
 0x16b   :  { %2472 = vmatprep.subr.bf16.mxu1 %v2471_v28  ;;  %2504 = vmatprep.subr.bf16.mxu0 %v2503_v29  ;;  %v401_v25 = vld [vmem:[#allocation8 + $0x760] sm:$0xff]  ;;  %v371_v28 = vld [vmem:[#allocation8 + $0x670] sm:$0xff] }
 0x16c   :  { %v403_v29 = vld [vmem:[#allocation8 + $0x770] sm:$0xff]  ;;  %v2525_v34 = vpack.c.bf16 %v401_v25, %v369_v24  ;;  %v2575_v24 = vpack.c.bf16 %v214_v17, %v182_v16  ;;  %v2607_v25 = vpack.c.bf16 %v216_v19, %v184_v18  ;;  %v504_v16 = vld [vmem:[#allocation8 + $0xa98] sm:$0xff] }
 0x16d   :  { %v2557_v35 = vpack.c.bf16 %v403_v29, %v371_v28  ;;  %v246_v28 = vld [vmem:[#allocation8 + $0x288] sm:$0xff]  ;;  %v536_v17 = vld [vmem:[#allocation8 + $0xb98] sm:$0xff] }
 0x16e   :  { %2474 = vmatpush1.bf16.msra.mxu1 %v2473_v36  ;;  %2506 = vmatpush1.bf16.msra.mxu0 %v2505_v37  ;;  %v433_v36 = vld [vmem:[#allocation8 + $0x860] sm:$0xff]  ;;  %v278_v29 = vld [vmem:[#allocation8 + $0x388] sm:$0xff] }
 0x16f   :  { %2476 = vmatprep.subr.bf16.mxu1 %v2475_v40  ;;  %2508 = vmatprep.subr.bf16.mxu0 %v2507_v41  ;;  %v465_v37 = vld [vmem:[#allocation8 + $0x960] sm:$0xff]  ;;  %v435_v40 = vld [vmem:[#allocation8 + $0x870] sm:$0xff] }
 0x170   :  { %v467_v41 = vld [vmem:[#allocation8 + $0x970] sm:$0xff]  ;;  %v2529_v46 = vpack.c.bf16 %v465_v37, %v433_v36  ;;  %v2579_v36 = vpack.c.bf16 %v278_v29, %v246_v28  ;;  %v2611_v37 = vpack.c.bf16 %v280_v31, %v248_v30  ;;  %v568_v28 = vld [vmem:[#allocation8 + $0xc98] sm:$0xff] }
 0x171   :  { %v2561_v47 = vpack.c.bf16 %v467_v41, %v435_v40  ;;  %v310_v40 = vld [vmem:[#allocation8 + $0x488] sm:$0xff]  ;;  %v600_v29 = vld [vmem:[#allocation8 + $0xd98] sm:$0xff] }
 0x172   :  { %2478 = vmatpush1.bf16.msra.mxu1 %v2477_v48  ;;  %2510 = vmatpush1.bf16.msra.mxu0 %v2509_v49  ;;  %v497_v48 = vld [vmem:[#allocation8 + $0xa60] sm:$0xff]  ;;  %v342_v41 = vld [vmem:[#allocation8 + $0x588] sm:$0xff] }
 0x173   :  { %2512 = vmatprep.subr.bf16.mxu1 %v2511_v52  ;;  %2544 = vmatprep.subr.bf16.mxu0 %v2543_v53  ;;  %v529_v49 = vld [vmem:[#allocation8 + $0xb60] sm:$0xff]  ;;  %v499_v52 = vld [vmem:[#allocation8 + $0xa70] sm:$0xff] }
 0x174   :  { %v531_v53 = vld [vmem:[#allocation8 + $0xb70] sm:$0xff]  ;;  %v2533_v59 = vpack.c.bf16 %v529_v49, %v497_v48  ;;  %v2583_v48 = vpack.c.bf16 %v342_v41, %v310_v40  ;;  %v2615_v49 = vpack.c.bf16 %v344_v43, %v312_v42  ;;  %v632_v40 = vld [vmem:[#allocation8 + $0xe98] sm:$0xff] }
 0x175   :  { %1194 = vmatmul.mubr.f32.vlgmr.msra.gmra.mrb[4].mxu1 %v3158_v58  ;;  %1265 = vmatmul.mubr.f32.vlgmr.msra.gmra.mrb[6].mxu0 %v3158_v58  ;;  %v2565_v60 = vpack.c.bf16 %v531_v53, %v499_v52  ;;  %v374_v52 = vld [vmem:[#allocation8 + $0x688] sm:$0xff]  ;;  %v664_v41 = vld [vmem:[#allocation8 + $0xf98] sm:$0xff] }
 0x176   :  { %2514 = vmatpush1.bf16.msra.mxu1 %v2513_v61  ;;  %2546 = vmatpush1.bf16.msra.mxu0 %v2545_v62  ;;  %v561_v61 = vld [vmem:[#allocation8 + $0xc60] sm:$0xff]  ;;  %v406_v53 = vld [vmem:[#allocation8 + $0x788] sm:$0xff] }
 0x177   :  { %2516 = vmatprep.subr.bf16.mxu1 %v2515_v2  ;;  %2548 = vmatprep.subr.bf16.mxu0 %v2547_v3  ;;  %v593_v62 = vld [vmem:[#allocation8 + $0xd60] sm:$0xff]  ;;  %v563_v2 = vld [vmem:[#allocation8 + $0xc70] sm:$0xff] }
 0x178   :  { %1335 = vmatprep.mubr.f32.mxu1 %v3053_v0  ;;  %1406 = vmatprep.mubr.f32.mxu0 %v3053_v0  ;;  %v595_v3 = vld [vmem:[#allocation8 + $0xd70] sm:$0xff]  ;;  %v2537_v8 = vpack.c.bf16 %v593_v62, %v561_v61  ;;  %v2587_v61 = vpack.c.bf16 %v406_v53, %v374_v52  ;;  %v2619_v62 = vpack.c.bf16 %v408_v55, %v376_v54  ;;  %v188_v52 = vld [vmem:[#allocation8 + $0xb8] sm:$0xff] }
 0x179   :  { %v2569_v9 = vpack.c.bf16 %v595_v3, %v563_v2  ;;  %v438_v2 = vld [vmem:[#allocation8 + $0x888] sm:$0xff]  ;;  %v220_v53 = vld [vmem:[#allocation8 + $0x1b8] sm:$0xff] }
 0x17a   :  { %2518 = vmatpush1.bf16.msra.mxu1 %v2517_v10  ;;  %2550 = vmatpush1.bf16.msra.mxu0 %v2549_v11  ;;  %v625_v10 = vld [vmem:[#allocation8 + $0xe60] sm:$0xff]  ;;  %v470_v3 = vld [vmem:[#allocation8 + $0x988] sm:$0xff] }
 0x17b   :  { %2520 = vmatprep.subr.bf16.mxu1 %v2519_v14  ;;  %2552 = vmatprep.subr.bf16.mxu0 %v2551_v15  ;;  %v657_v11 = vld [vmem:[#allocation8 + $0xf60] sm:$0xff]  ;;  %v627_v14 = vld [vmem:[#allocation8 + $0xe70] sm:$0xff] }
 0x17c   :  { %v659_v15 = vld [vmem:[#allocation8 + $0xf70] sm:$0xff]  ;;  %v2541_v20 = vpack.c.bf16 %v657_v11, %v625_v10  ;;  %v2591_v10 = vpack.c.bf16 %v470_v3, %v438_v2  ;;  %v2623_v11 = vpack.c.bf16 %v472_v5, %v440_v4  ;;  %v252_v2 = vld [vmem:[#allocation8 + $0x2b8] sm:$0xff] }
 0x17d   :  { %v2573_v21 = vpack.c.bf16 %v659_v15, %v627_v14  ;;  %v502_v14 = vld [vmem:[#allocation8 + $0xa88] sm:$0xff]  ;;  %v284_v3 = vld [vmem:[#allocation8 + $0x3b8] sm:$0xff] }
 0x17e   :  { %2522 = vmatpush1.bf16.msra.mxu1 %v2521_v22  ;;  %2554 = vmatpush1.bf16.msra.mxu0 %v2553_v23  ;;  %v181_v22 = vld [vmem:[#allocation8 + $0x80] sm:$0xff]  ;;  %v534_v15 = vld [vmem:[#allocation8 + $0xb88] sm:$0xff] }
 0x17f   :  { %2524 = vmatprep.subr.bf16.mxu1 %v2523_v26  ;;  %2556 = vmatprep.subr.bf16.mxu0 %v2555_v27  ;;  %v213_v23 = vld [vmem:[#allocation8 + $0x180] sm:$0xff]  ;;  %v183_v26 = vld [vmem:[#allocation8 + $0x90] sm:$0xff] }
 0x180   :  { %v215_v27 = vld [vmem:[#allocation8 + $0x190] sm:$0xff]  ;;  %v2577_v32 = vpack.c.bf16 %v213_v23, %v181_v22  ;;  %v2595_v22 = vpack.c.bf16 %v534_v15, %v502_v14  ;;  %v2627_v23 = vpack.c.bf16 %v536_v17, %v504_v16  ;;  %v316_v14 = vld [vmem:[#allocation8 + $0x4b8] sm:$0xff] }
 0x181   :  { %v2609_v33 = vpack.c.bf16 %v215_v27, %v183_v26  ;;  %v566_v26 = vld [vmem:[#allocation8 + $0xc88] sm:$0xff]  ;;  %v348_v15 = vld [vmem:[#allocation8 + $0x5b8] sm:$0xff] }
 0x182   :  { %2526 = vmatpush1.bf16.msra.mxu1 %v2525_v34  ;;  %2558 = vmatpush1.bf16.msra.mxu0 %v2557_v35  ;;  %v245_v34 = vld [vmem:[#allocation8 + $0x280] sm:$0xff]  ;;  %v598_v27 = vld [vmem:[#allocation8 + $0xd88] sm:$0xff] }
 0x183   :  { %2528 = vmatprep.subr.bf16.mxu1 %v2527_v38  ;;  %2560 = vmatprep.subr.bf16.mxu0 %v2559_v39  ;;  %v277_v35 = vld [vmem:[#allocation8 + $0x380] sm:$0xff]  ;;  %v247_v38 = vld [vmem:[#allocation8 + $0x290] sm:$0xff] }
 0x184   :  { %v279_v39 = vld [vmem:[#allocation8 + $0x390] sm:$0xff]  ;;  %v2581_v44 = vpack.c.bf16 %v277_v35, %v245_v34  ;;  %v2599_v34 = vpack.c.bf16 %v598_v27, %v566_v26  ;;  %v2631_v35 = vpack.c.bf16 %v600_v29, %v568_v28  ;;  %v380_v26 = vld [vmem:[#allocation8 + $0x6b8] sm:$0xff] }
 0x185   :  { %v2613_v45 = vpack.c.bf16 %v279_v39, %v247_v38  ;;  %v630_v38 = vld [vmem:[#allocation8 + $0xe88] sm:$0xff]  ;;  %v412_v27 = vld [vmem:[#allocation8 + $0x7b8] sm:$0xff] }
 0x186   :  { %2530 = vmatpush1.bf16.msra.mxu1 %v2529_v46  ;;  %2562 = vmatpush1.bf16.msra.mxu0 %v2561_v47  ;;  %v309_v46 = vld [vmem:[#allocation8 + $0x480] sm:$0xff]  ;;  %v662_v39 = vld [vmem:[#allocation8 + $0xf88] sm:$0xff] }
 0x187   :  { %2532 = vmatprep.subr.bf16.mxu1 %v2531_v50  ;;  %2564 = vmatprep.subr.bf16.mxu0 %v2563_v51  ;;  %v341_v47 = vld [vmem:[#allocation8 + $0x580] sm:$0xff]  ;;  %v311_v50 = vld [vmem:[#allocation8 + $0x490] sm:$0xff] }
 0x188   :  { %v343_v51 = vld [vmem:[#allocation8 + $0x590] sm:$0xff]  ;;  %v2585_v56 = vpack.c.bf16 %v341_v47, %v309_v46  ;;  %v2603_v46 = vpack.c.bf16 %v662_v39, %v630_v38  ;;  %v2635_v47 = vpack.c.bf16 %v664_v41, %v632_v40  ;;  %v444_v38 = vld [vmem:[#allocation8 + $0x8b8] sm:$0xff] }
 0x189   :  { %v2617_v57 = vpack.c.bf16 %v343_v51, %v311_v50  ;;  %v186_v50 = vld [vmem:[#allocation8 + $0xa8] sm:$0xff]  ;;  %v476_v39 = vld [vmem:[#allocation8 + $0x9b8] sm:$0xff] }
 0x18a   :  { %2534 = vmatpush1.bf16.msra.mxu1 %v2533_v59  ;;  %2566 = vmatpush1.bf16.msra.mxu0 %v2565_v60  ;;  %v373_v59 = vld [vmem:[#allocation8 + $0x680] sm:$0xff]  ;;  %v218_v51 = vld [vmem:[#allocation8 + $0x1a8] sm:$0xff] }
 0x18b   :  { %2536 = vmatprep.subr.bf16.mxu1 %v2535_v63  ;;  %2568 = vmatprep.subr.bf16.mxu0 %v2567_v1  ;;  %v405_v60 = vld [vmem:[#allocation8 + $0x780] sm:$0xff]  ;;  %v375_v63 = vld [vmem:[#allocation8 + $0x690] sm:$0xff] }
 0x18c   :  { %v407_v1 = vld [vmem:[#allocation8 + $0x790] sm:$0xff]  ;;  %v2589_v6 = vpack.c.bf16 %v405_v60, %v373_v59  ;;  %v2639_v59 = vpack.c.bf16 %v218_v51, %v186_v50  ;;  %v2671_v60 = vpack.c.bf16 %v220_v53, %v188_v52  ;;  %v508_v50 = vld [vmem:[#allocation8 + $0xab8] sm:$0xff] }
 0x18d   :  { %v2621_v7 = vpack.c.bf16 %v407_v1, %v375_v63  ;;  %v250_v63 = vld [vmem:[#allocation8 + $0x2a8] sm:$0xff]  ;;  %v540_v51 = vld [vmem:[#allocation8 + $0xbb8] sm:$0xff] }
 0x18e   :  { %2538 = vmatpush1.bf16.msra.mxu1 %v2537_v8  ;;  %2570 = vmatpush1.bf16.msra.mxu0 %v2569_v9  ;;  %v437_v8 = vld [vmem:[#allocation8 + $0x880] sm:$0xff]  ;;  %v282_v1 = vld [vmem:[#allocation8 + $0x3a8] sm:$0xff] }
 0x18f   :  { %2540 = vmatprep.subr.bf16.mxu1 %v2539_v12  ;;  %2572 = vmatprep.subr.bf16.mxu0 %v2571_v13  ;;  %v469_v9 = vld [vmem:[#allocation8 + $0x980] sm:$0xff]  ;;  %v439_v12 = vld [vmem:[#allocation8 + $0x890] sm:$0xff] }
 0x190   :  { %v471_v13 = vld [vmem:[#allocation8 + $0x990] sm:$0xff]  ;;  %v2593_v18 = vpack.c.bf16 %v469_v9, %v437_v8  ;;  %v2643_v8 = vpack.c.bf16 %v282_v1, %v250_v63  ;;  %v2675_v9 = vpack.c.bf16 %v284_v3, %v252_v2  ;;  %v572_v63 = vld [vmem:[#allocation8 + $0xcb8] sm:$0xff] }
 0x191   :  { %v2625_v19 = vpack.c.bf16 %v471_v13, %v439_v12  ;;  %v314_v12 = vld [vmem:[#allocation8 + $0x4a8] sm:$0xff]  ;;  %v604_v1 = vld [vmem:[#allocation8 + $0xdb8] sm:$0xff] }
 0x192   :  { %2542 = vmatpush1.bf16.msra.mxu1 %v2541_v20  ;;  %2574 = vmatpush1.bf16.msra.mxu0 %v2573_v21  ;;  %v501_v20 = vld [vmem:[#allocation8 + $0xa80] sm:$0xff]  ;;  %v346_v13 = vld [vmem:[#allocation8 + $0x5a8] sm:$0xff] }
 0x193   :  { %2576 = vmatprep.subr.bf16.mxu1 %v2575_v24  ;;  %2608 = vmatprep.subr.bf16.mxu0 %v2607_v25  ;;  %v533_v21 = vld [vmem:[#allocation8 + $0xb80] sm:$0xff]  ;;  %v503_v24 = vld [vmem:[#allocation8 + $0xa90] sm:$0xff] }
 0x194   :  { %v535_v25 = vld [vmem:[#allocation8 + $0xb90] sm:$0xff]  ;;  %v2597_v30 = vpack.c.bf16 %v533_v21, %v501_v20  ;;  %v2647_v20 = vpack.c.bf16 %v346_v13, %v314_v12  ;;  %v2679_v21 = vpack.c.bf16 %v348_v15, %v316_v14  ;;  %v636_v12 = vld [vmem:[#allocation8 + $0xeb8] sm:$0xff] }
 0x195   :  { %1336 = vmatmul.mubr.f32.vlgmr.msra.gmra.mrb[6].mxu1 %v3158_v58  ;;  %1407 = vmatmul.mubr.f32.vlgmr.msra.gmra.mrb[8].mxu0 %v3158_v58  ;;  %v2629_v31 = vpack.c.bf16 %v535_v25, %v503_v24  ;;  %v378_v24 = vld [vmem:[#allocation8 + $0x6a8] sm:$0xff]  ;;  %v668_v13 = vld [vmem:[#allocation8 + $0xfb8] sm:$0xff] }
 0x196   :  { %2578 = vmatpush1.bf16.msra.mxu1 %v2577_v32  ;;  %2610 = vmatpush1.bf16.msra.mxu0 %v2609_v33  ;;  %v565_v32 = vld [vmem:[#allocation8 + $0xc80] sm:$0xff]  ;;  %v410_v25 = vld [vmem:[#allocation8 + $0x7a8] sm:$0xff] }
 0x197   :  { %2580 = vmatprep.subr.bf16.mxu1 %v2579_v36  ;;  %2612 = vmatprep.subr.bf16.mxu0 %v2611_v37  ;;  %v597_v33 = vld [vmem:[#allocation8 + $0xd80] sm:$0xff]  ;;  %v567_v36 = vld [vmem:[#allocation8 + $0xc90] sm:$0xff] }
 0x198   :  { %1477 = vmatprep.mubr.f32.mxu1 %v3053_v0  ;;  %1548 = vmatprep.mubr.f32.mxu0 %v3053_v0  ;;  %v599_v37 = vld [vmem:[#allocation8 + $0xd90] sm:$0xff]  ;;  %v2601_v42 = vpack.c.bf16 %v597_v33, %v565_v32  ;;  %v2651_v32 = vpack.c.bf16 %v410_v25, %v378_v24  ;;  %v2683_v33 = vpack.c.bf16 %v412_v27, %v380_v26  ;;  %v192_v24 = vld [vmem:[#allocation8 + $0xd8] sm:$0xff] }
 0x199   :  { %v2633_v43 = vpack.c.bf16 %v599_v37, %v567_v36  ;;  %v442_v36 = vld [vmem:[#allocation8 + $0x8a8] sm:$0xff]  ;;  %v224_v25 = vld [vmem:[#allocation8 + $0x1d8] sm:$0xff] }
 0x19a   :  { %2582 = vmatpush1.bf16.msra.mxu1 %v2581_v44  ;;  %2614 = vmatpush1.bf16.msra.mxu0 %v2613_v45  ;;  %v629_v44 = vld [vmem:[#allocation8 + $0xe80] sm:$0xff]  ;;  %v474_v37 = vld [vmem:[#allocation8 + $0x9a8] sm:$0xff] }
 0x19b   :  { %2584 = vmatprep.subr.bf16.mxu1 %v2583_v48  ;;  %2616 = vmatprep.subr.bf16.mxu0 %v2615_v49  ;;  %v661_v45 = vld [vmem:[#allocation8 + $0xf80] sm:$0xff]  ;;  %v631_v48 = vld [vmem:[#allocation8 + $0xe90] sm:$0xff] }
 0x19c   :  { %v663_v49 = vld [vmem:[#allocation8 + $0xf90] sm:$0xff]  ;;  %v2605_v54 = vpack.c.bf16 %v661_v45, %v629_v44  ;;  %v2655_v44 = vpack.c.bf16 %v474_v37, %v442_v36  ;;  %v2687_v45 = vpack.c.bf16 %v476_v39, %v444_v38  ;;  %v256_v36 = vld [vmem:[#allocation8 + $0x2d8] sm:$0xff] }
 0x19d   :  { %v2637_v55 = vpack.c.bf16 %v663_v49, %v631_v48  ;;  %v506_v48 = vld [vmem:[#allocation8 + $0xaa8] sm:$0xff]  ;;  %v288_v37 = vld [vmem:[#allocation8 + $0x3d8] sm:$0xff] }
 0x19e   :  { %2586 = vmatpush1.bf16.msra.mxu1 %v2585_v56  ;;  %2618 = vmatpush1.bf16.msra.mxu0 %v2617_v57  ;;  %v185_v56 = vld [vmem:[#allocation8 + $0xa0] sm:$0xff]  ;;  %v538_v49 = vld [vmem:[#allocation8 + $0xba8] sm:$0xff] }
 0x19f   :  { %2588 = vmatprep.subr.bf16.mxu1 %v2587_v61  ;;  %2620 = vmatprep.subr.bf16.mxu0 %v2619_v62  ;;  %v217_v57 = vld [vmem:[#allocation8 + $0x1a0] sm:$0xff]  ;;  %v187_v61 = vld [vmem:[#allocation8 + $0xb0] sm:$0xff] }
 0x1a0   :  { %v219_v62 = vld [vmem:[#allocation8 + $0x1b0] sm:$0xff]  ;;  %v2641_v4 = vpack.c.bf16 %v217_v57, %v185_v56  ;;  %v2659_v56 = vpack.c.bf16 %v538_v49, %v506_v48  ;;  %v2691_v57 = vpack.c.bf16 %v540_v51, %v508_v50  ;;  %v320_v48 = vld [vmem:[#allocation8 + $0x4d8] sm:$0xff] }
 0x1a1   :  { %v2673_v5 = vpack.c.bf16 %v219_v62, %v187_v61  ;;  %v570_v61 = vld [vmem:[#allocation8 + $0xca8] sm:$0xff]  ;;  %v352_v49 = vld [vmem:[#allocation8 + $0x5d8] sm:$0xff] }
 0x1a2   :  { %2590 = vmatpush1.bf16.msra.mxu1 %v2589_v6  ;;  %2622 = vmatpush1.bf16.msra.mxu0 %v2621_v7  ;;  %v249_v6 = vld [vmem:[#allocation8 + $0x2a0] sm:$0xff]  ;;  %v602_v62 = vld [vmem:[#allocation8 + $0xda8] sm:$0xff] }
 0x1a3   :  { %2592 = vmatprep.subr.bf16.mxu1 %v2591_v10  ;;  %2624 = vmatprep.subr.bf16.mxu0 %v2623_v11  ;;  %v281_v7 = vld [vmem:[#allocation8 + $0x3a0] sm:$0xff]  ;;  %v251_v10 = vld [vmem:[#allocation8 + $0x2b0] sm:$0xff] }
 0x1a4   :  { %v283_v11 = vld [vmem:[#allocation8 + $0x3b0] sm:$0xff]  ;;  %v2645_v16 = vpack.c.bf16 %v281_v7, %v249_v6  ;;  %v2663_v6 = vpack.c.bf16 %v602_v62, %v570_v61  ;;  %v2695_v7 = vpack.c.bf16 %v604_v1, %v572_v63  ;;  %v384_v61 = vld [vmem:[#allocation8 + $0x6d8] sm:$0xff] }
 0x1a5   :  { %v2677_v17 = vpack.c.bf16 %v283_v11, %v251_v10  ;;  %v634_v10 = vld [vmem:[#allocation8 + $0xea8] sm:$0xff]  ;;  %v416_v62 = vld [vmem:[#allocation8 + $0x7d8] sm:$0xff] }
 0x1a6   :  { %2594 = vmatpush1.bf16.msra.mxu1 %v2593_v18  ;;  %2626 = vmatpush1.bf16.msra.mxu0 %v2625_v19  ;;  %v313_v18 = vld [vmem:[#allocation8 + $0x4a0] sm:$0xff]  ;;  %v666_v11 = vld [vmem:[#allocation8 + $0xfa8] sm:$0xff] }
 0x1a7   :  { %2596 = vmatprep.subr.bf16.mxu1 %v2595_v22  ;;  %2628 = vmatprep.subr.bf16.mxu0 %v2627_v23  ;;  %v345_v19 = vld [vmem:[#allocation8 + $0x5a0] sm:$0xff]  ;;  %v315_v22 = vld [vmem:[#allocation8 + $0x4b0] sm:$0xff] }
 0x1a8   :  { %v347_v23 = vld [vmem:[#allocation8 + $0x5b0] sm:$0xff]  ;;  %v2649_v28 = vpack.c.bf16 %v345_v19, %v313_v18  ;;  %v2667_v18 = vpack.c.bf16 %v666_v11, %v634_v10  ;;  %v2699_v19 = vpack.c.bf16 %v668_v13, %v636_v12  ;;  %v448_v10 = vld [vmem:[#allocation8 + $0x8d8] sm:$0xff] }
 0x1a9   :  { %v2681_v29 = vpack.c.bf16 %v347_v23, %v315_v22  ;;  %v190_v22 = vld [vmem:[#allocation8 + $0xc8] sm:$0xff]  ;;  %v480_v11 = vld [vmem:[#allocation8 + $0x9d8] sm:$0xff] }
 0x1aa   :  { %2598 = vmatpush1.bf16.msra.mxu1 %v2597_v30  ;;  %2630 = vmatpush1.bf16.msra.mxu0 %v2629_v31  ;;  %v377_v30 = vld [vmem:[#allocation8 + $0x6a0] sm:$0xff]  ;;  %v222_v23 = vld [vmem:[#allocation8 + $0x1c8] sm:$0xff] }
 0x1ab   :  { %2600 = vmatprep.subr.bf16.mxu1 %v2599_v34  ;;  %2632 = vmatprep.subr.bf16.mxu0 %v2631_v35  ;;  %v409_v31 = vld [vmem:[#allocation8 + $0x7a0] sm:$0xff]  ;;  %v379_v34 = vld [vmem:[#allocation8 + $0x6b0] sm:$0xff] }
 0x1ac   :  { %v411_v35 = vld [vmem:[#allocation8 + $0x7b0] sm:$0xff]  ;;  %v2653_v40 = vpack.c.bf16 %v409_v31, %v377_v30  ;;  %v2703_v30 = vpack.c.bf16 %v222_v23, %v190_v22  ;;  %v2735_v31 = vpack.c.bf16 %v224_v25, %v192_v24  ;;  %v512_v22 = vld [vmem:[#allocation8 + $0xad8] sm:$0xff] }
 0x1ad   :  { %v2685_v41 = vpack.c.bf16 %v411_v35, %v379_v34  ;;  %v254_v34 = vld [vmem:[#allocation8 + $0x2c8] sm:$0xff]  ;;  %v544_v23 = vld [vmem:[#allocation8 + $0xbd8] sm:$0xff] }
 0x1ae   :  { %2602 = vmatpush1.bf16.msra.mxu1 %v2601_v42  ;;  %2634 = vmatpush1.bf16.msra.mxu0 %v2633_v43  ;;  %v441_v42 = vld [vmem:[#allocation8 + $0x8a0] sm:$0xff]  ;;  %v286_v35 = vld [vmem:[#allocation8 + $0x3c8] sm:$0xff] }
 0x1af   :  { %2604 = vmatprep.subr.bf16.mxu1 %v2603_v46  ;;  %2636 = vmatprep.subr.bf16.mxu0 %v2635_v47  ;;  %v473_v43 = vld [vmem:[#allocation8 + $0x9a0] sm:$0xff]  ;;  %v443_v46 = vld [vmem:[#allocation8 + $0x8b0] sm:$0xff] }
 0x1b0   :  { %v475_v47 = vld [vmem:[#allocation8 + $0x9b0] sm:$0xff]  ;;  %v2657_v52 = vpack.c.bf16 %v473_v43, %v441_v42  ;;  %v2707_v42 = vpack.c.bf16 %v286_v35, %v254_v34  ;;  %v2739_v43 = vpack.c.bf16 %v288_v37, %v256_v36  ;;  %v576_v34 = vld [vmem:[#allocation8 + $0xcd8] sm:$0xff] }
 0x1b1   :  { %v2689_v53 = vpack.c.bf16 %v475_v47, %v443_v46  ;;  %v318_v46 = vld [vmem:[#allocation8 + $0x4c8] sm:$0xff]  ;;  %v608_v35 = vld [vmem:[#allocation8 + $0xdd8] sm:$0xff] }
 0x1b2   :  { %2606 = vmatpush1.bf16.msra.mxu1 %v2605_v54  ;;  %2638 = vmatpush1.bf16.msra.mxu0 %v2637_v55  ;;  %v505_v54 = vld [vmem:[#allocation8 + $0xaa0] sm:$0xff]  ;;  %v350_v47 = vld [vmem:[#allocation8 + $0x5c8] sm:$0xff] }
 0x1b3   :  { %2640 = vmatprep.subr.bf16.mxu1 %v2639_v59  ;;  %2672 = vmatprep.subr.bf16.mxu0 %v2671_v60  ;;  %v537_v55 = vld [vmem:[#allocation8 + $0xba0] sm:$0xff]  ;;  %v507_v59 = vld [vmem:[#allocation8 + $0xab0] sm:$0xff] }
 0x1b4   :  { %v539_v60 = vld [vmem:[#allocation8 + $0xbb0] sm:$0xff]  ;;  %v2661_v2 = vpack.c.bf16 %v537_v55, %v505_v54  ;;  %v2711_v54 = vpack.c.bf16 %v350_v47, %v318_v46  ;;  %v2743_v55 = vpack.c.bf16 %v352_v49, %v320_v48  ;;  %v640_v46 = vld [vmem:[#allocation8 + $0xed8] sm:$0xff] }
 0x1b5   :  { %1478 = vmatmul.mubr.f32.vlgmr.msra.gmra.mrb[8].mxu1 %v3158_v58  ;;  %1549 = vmatmul.mubr.f32.vlgmr.msra.gmra.mrb[10].mxu0 %v3158_v58  ;;  %v2693_v3 = vpack.c.bf16 %v539_v60, %v507_v59  ;;  %v382_v59 = vld [vmem:[#allocation8 + $0x6c8] sm:$0xff]  ;;  %v672_v47 = vld [vmem:[#allocation8 + $0xfd8] sm:$0xff] }
 0x1b6   :  { %2642 = vmatpush1.bf16.msra.mxu1 %v2641_v4  ;;  %2674 = vmatpush1.bf16.msra.mxu0 %v2673_v5  ;;  %v569_v4 = vld [vmem:[#allocation8 + $0xca0] sm:$0xff]  ;;  %v414_v60 = vld [vmem:[#allocation8 + $0x7c8] sm:$0xff] }
 0x1b7   :  { %2644 = vmatprep.subr.bf16.mxu1 %v2643_v8  ;;  %2676 = vmatprep.subr.bf16.mxu0 %v2675_v9  ;;  %v601_v5 = vld [vmem:[#allocation8 + $0xda0] sm:$0xff]  ;;  %v571_v8 = vld [vmem:[#allocation8 + $0xcb0] sm:$0xff] }
 0x1b8   :  { %1619 = vmatprep.mubr.f32.mxu1 %v3053_v0  ;;  %1690 = vmatprep.mubr.f32.mxu0 %v3053_v0  ;;  %v603_v9 = vld [vmem:[#allocation8 + $0xdb0] sm:$0xff]  ;;  %v2665_v14 = vpack.c.bf16 %v601_v5, %v569_v4  ;;  %v2715_v4 = vpack.c.bf16 %v414_v60, %v382_v59  ;;  %v2747_v5 = vpack.c.bf16 %v416_v62, %v384_v61  ;;  %v196_v59 = vld [vmem:[#allocation8 + $0xf8] sm:$0xff] }
 0x1b9   :  { %v2697_v15 = vpack.c.bf16 %v603_v9, %v571_v8  ;;  %v446_v8 = vld [vmem:[#allocation8 + $0x8c8] sm:$0xff]  ;;  %v228_v60 = vld [vmem:[#allocation8 + $0x1f8] sm:$0xff] }
 0x1ba   :  { %2646 = vmatpush1.bf16.msra.mxu1 %v2645_v16  ;;  %2678 = vmatpush1.bf16.msra.mxu0 %v2677_v17  ;;  %v633_v16 = vld [vmem:[#allocation8 + $0xea0] sm:$0xff]  ;;  %v478_v9 = vld [vmem:[#allocation8 + $0x9c8] sm:$0xff] }
 0x1bb   :  { %2648 = vmatprep.subr.bf16.mxu1 %v2647_v20  ;;  %2680 = vmatprep.subr.bf16.mxu0 %v2679_v21  ;;  %v665_v17 = vld [vmem:[#allocation8 + $0xfa0] sm:$0xff]  ;;  %v635_v20 = vld [vmem:[#allocation8 + $0xeb0] sm:$0xff] }
 0x1bc   :  { %v667_v21 = vld [vmem:[#allocation8 + $0xfb0] sm:$0xff]  ;;  %v2669_v26 = vpack.c.bf16 %v665_v17, %v633_v16  ;;  %v2719_v16 = vpack.c.bf16 %v478_v9, %v446_v8  ;;  %v2751_v17 = vpack.c.bf16 %v480_v11, %v448_v10  ;;  %v260_v8 = vld [vmem:[#allocation8 + $0x2f8] sm:$0xff] }
 0x1bd   :  { %v2701_v27 = vpack.c.bf16 %v667_v21, %v635_v20  ;;  %v510_v20 = vld [vmem:[#allocation8 + $0xac8] sm:$0xff]  ;;  %v292_v9 = vld [vmem:[#allocation8 + $0x3f8] sm:$0xff] }
 0x1be   :  { %2650 = vmatpush1.bf16.msra.mxu1 %v2649_v28  ;;  %2682 = vmatpush1.bf16.msra.mxu0 %v2681_v29  ;;  %v189_v28 = vld [vmem:[#allocation8 + $0xc0] sm:$0xff]  ;;  %v542_v21 = vld [vmem:[#allocation8 + $0xbc8] sm:$0xff] }
 0x1bf   :  { %2652 = vmatprep.subr.bf16.mxu1 %v2651_v32  ;;  %2684 = vmatprep.subr.bf16.mxu0 %v2683_v33  ;;  %v221_v29 = vld [vmem:[#allocation8 + $0x1c0] sm:$0xff]  ;;  %v191_v32 = vld [vmem:[#allocation8 + $0xd0] sm:$0xff] }
 0x1c0   :  { %v223_v33 = vld [vmem:[#allocation8 + $0x1d0] sm:$0xff]  ;;  %v2705_v38 = vpack.c.bf16 %v221_v29, %v189_v28  ;;  %v2723_v28 = vpack.c.bf16 %v542_v21, %v510_v20  ;;  %v2755_v29 = vpack.c.bf16 %v544_v23, %v512_v22  ;;  %v324_v20 = vld [vmem:[#allocation8 + $0x4f8] sm:$0xff] }
 0x1c1   :  { %v2737_v39 = vpack.c.bf16 %v223_v33, %v191_v32  ;;  %v574_v32 = vld [vmem:[#allocation8 + $0xcc8] sm:$0xff]  ;;  %v356_v21 = vld [vmem:[#allocation8 + $0x5f8] sm:$0xff] }
 0x1c2   :  { %2654 = vmatpush1.bf16.msra.mxu1 %v2653_v40  ;;  %2686 = vmatpush1.bf16.msra.mxu0 %v2685_v41  ;;  %v253_v40 = vld [vmem:[#allocation8 + $0x2c0] sm:$0xff]  ;;  %v606_v33 = vld [vmem:[#allocation8 + $0xdc8] sm:$0xff] }
 0x1c3   :  { %2656 = vmatprep.subr.bf16.mxu1 %v2655_v44  ;;  %2688 = vmatprep.subr.bf16.mxu0 %v2687_v45  ;;  %v285_v41 = vld [vmem:[#allocation8 + $0x3c0] sm:$0xff]  ;;  %v255_v44 = vld [vmem:[#allocation8 + $0x2d0] sm:$0xff] }
 0x1c4   :  { %v287_v45 = vld [vmem:[#allocation8 + $0x3d0] sm:$0xff]  ;;  %v2709_v50 = vpack.c.bf16 %v285_v41, %v253_v40  ;;  %v2727_v40 = vpack.c.bf16 %v606_v33, %v574_v32  ;;  %v2759_v41 = vpack.c.bf16 %v608_v35, %v576_v34  ;;  %v388_v32 = vld [vmem:[#allocation8 + $0x6f8] sm:$0xff]  ;;  %v685_v34 = vlaneseq }
 0x1c5   :  { %v2741_v51 = vpack.c.bf16 %v287_v45, %v255_v44  ;;  %v638_v44 = vld [vmem:[#allocation8 + $0xec8] sm:$0xff]  ;;  %v420_v33 = vld [vmem:[#allocation8 + $0x7f8] sm:$0xff] }
 0x1c6   :  { %2658 = vmatpush1.bf16.msra.mxu1 %v2657_v52  ;;  %2690 = vmatpush1.bf16.msra.mxu0 %v2689_v53  ;;  %v317_v52 = vld [vmem:[#allocation8 + $0x4c0] sm:$0xff]  ;;  %v670_v45 = vld [vmem:[#allocation8 + $0xfc8] sm:$0xff] }
 0x1c7   :  { %2660 = vmatprep.subr.bf16.mxu1 %v2659_v56  ;;  %2692 = vmatprep.subr.bf16.mxu0 %v2691_v57  ;;  %v349_v53 = vld [vmem:[#allocation8 + $0x5c0] sm:$0xff]  ;;  %v319_v56 = vld [vmem:[#allocation8 + $0x4d0] sm:$0xff] }
 0x1c8   :  { %v351_v57 = vld [vmem:[#allocation8 + $0x5d0] sm:$0xff]  ;;  %v2713_v63 = vpack.c.bf16 %v349_v53, %v317_v52  ;;  %v2731_v52 = vpack.c.bf16 %v670_v45, %v638_v44  ;;  %v2763_v53 = vpack.c.bf16 %v672_v47, %v640_v46  ;;  %v482_v44 = vld [vmem:[#allocation8 + $0x9e8] sm:$0xff]  ;;  %v452_v45 = vld [vmem:[#allocation8 + $0x8f8] sm:$0xff]  ;;  %v3188_v47 = vshrl.u32 %v685_v34, 7 }
 0x1c9   :  { %v2745_v1 = vpack.c.bf16 %v351_v57, %v319_v56  ;;  %v194_v56 = vld [vmem:[#allocation8 + $0xe8] sm:$0xff]  ;;  %v484_v46 = vld [vmem:[#allocation8 + $0x9f8] sm:$0xff] }
 0x1ca   :  { %2662 = vmatpush1.bf16.msra.mxu1 %v2661_v2  ;;  %2694 = vmatpush1.bf16.msra.mxu0 %v2693_v3  ;;  %v381_v2 = vld [vmem:[#allocation8 + $0x6c0] sm:$0xff]  ;;  %v226_v57 = vld [vmem:[#allocation8 + $0x1e8] sm:$0xff] }
 0x1cb   :  { %2664 = vmatprep.subr.bf16.mxu1 %v2663_v6  ;;  %2696 = vmatprep.subr.bf16.mxu0 %v2695_v7  ;;  %v413_v3 = vld [vmem:[#allocation8 + $0x7c0] sm:$0xff]  ;;  %v383_v6 = vld [vmem:[#allocation8 + $0x6d0] sm:$0xff] }
 0x1cc   :  { %v415_v7 = vld [vmem:[#allocation8 + $0x7d0] sm:$0xff]  ;;  %v2717_v12 = vpack.c.bf16 %v413_v3, %v381_v2  ;;  %v2767_v2 = vpack.c.bf16 %v226_v57, %v194_v56  ;;  %v2799_v3 = vpack.c.bf16 %v228_v60, %v196_v59  ;;  %v546_v56 = vld [vmem:[#allocation8 + $0xbe8] sm:$0xff]  ;;  %v516_v57 = vld [vmem:[#allocation8 + $0xaf8] sm:$0xff]  ;;  %v3191_v60 = vsub.s32 0, %v3188_v47 }
 0x1cd   :  { %v2749_v13 = vpack.c.bf16 %v415_v7, %v383_v6  ;;  %v258_v6 = vld [vmem:[#allocation8 + $0x2e8] sm:$0xff]  ;;  %v548_v59 = vld [vmem:[#allocation8 + $0xbf8] sm:$0xff] }
 0x1ce   :  { %2666 = vmatpush1.bf16.msra.mxu1 %v2665_v14  ;;  %2698 = vmatpush1.bf16.msra.mxu0 %v2697_v15  ;;  %v445_v14 = vld [vmem:[#allocation8 + $0x8c0] sm:$0xff]  ;;  %v290_v7 = vld [vmem:[#allocation8 + $0x3e8] sm:$0xff] }
 0x1cf   :  { %2668 = vmatprep.subr.bf16.mxu1 %v2667_v18  ;;  %2700 = vmatprep.subr.bf16.mxu0 %v2699_v19  ;;  %v477_v15 = vld [vmem:[#allocation8 + $0x9c0] sm:$0xff]  ;;  %v447_v18 = vld [vmem:[#allocation8 + $0x8d0] sm:$0xff] }
 0x1d0   :  { %v479_v19 = vld [vmem:[#allocation8 + $0x9d0] sm:$0xff]  ;;  %v2721_v24 = vpack.c.bf16 %v477_v15, %v445_v14  ;;  %v2771_v14 = vpack.c.bf16 %v290_v7, %v258_v6  ;;  %v2803_v15 = vpack.c.bf16 %v292_v9, %v260_v8  ;;  %v2819_v7 = vpack.c.bf16 %v548_v59, %v516_v57 }
 0x1d1   :  { %v2753_v25 = vpack.c.bf16 %v479_v19, %v447_v18  ;;  %v322_v18 = vld [vmem:[#allocation8 + $0x4e8] sm:$0xff]  ;;  %v515_v8 = vld [vmem:[#allocation8 + $0xaf0] sm:$0xff] }
 0x1d2   :  { %2670 = vmatpush1.bf16.msra.mxu1 %v2669_v26  ;;  %2702 = vmatpush1.bf16.msra.mxu0 %v2701_v27  ;;  %v509_v26 = vld [vmem:[#allocation8 + $0xac0] sm:$0xff]  ;;  %v354_v19 = vld [vmem:[#allocation8 + $0x5e8] sm:$0xff]  ;;  %v547_v9 = vld [vmem:[#allocation8 + $0xbf0] sm:$0xff] }
 0x1d3   :  { %2704 = vmatprep.subr.bf16.mxu1 %v2703_v30  ;;  %2736 = vmatprep.subr.bf16.mxu0 %v2735_v31  ;;  %v541_v27 = vld [vmem:[#allocation8 + $0xbc0] sm:$0xff]  ;;  %v511_v30 = vld [vmem:[#allocation8 + $0xad0] sm:$0xff] }
 0x1d4   :  { %v543_v31 = vld [vmem:[#allocation8 + $0xbd0] sm:$0xff]  ;;  %v2725_v36 = vpack.c.bf16 %v541_v27, %v509_v26  ;;  %v2775_v26 = vpack.c.bf16 %v354_v19, %v322_v18  ;;  %v2807_v27 = vpack.c.bf16 %v356_v21, %v324_v20  ;;  %v2821_v19 = vpack.c.bf16 %v547_v9, %v515_v8  ;;  %v577_v20 = vld [vmem:[#allocation8 + $0xce0] sm:$0xff] }
 0x1d5   :  { %1620 = vmatmul.mubr.f32.vlgmr.msra.gmra.mrb[10].mxu1 %v3158_v58  ;;  %1691 = vmatmul.mubr.f32.vlgmr.msra.gmra.mrb[12].mxu0 %v3158_v58  ;;  %v2757_v37 = vpack.c.bf16 %v543_v31, %v511_v30  ;;  %v386_v30 = vld [vmem:[#allocation8 + $0x6e8] sm:$0xff]  ;;  %v609_v21 = vld [vmem:[#allocation8 + $0xde0] sm:$0xff] }
 0x1d6   :  { %2706 = vmatpush1.bf16.msra.mxu1 %v2705_v38  ;;  %2738 = vmatpush1.bf16.msra.mxu0 %v2737_v39  ;;  %v573_v38 = vld [vmem:[#allocation8 + $0xcc0] sm:$0xff]  ;;  %v418_v31 = vld [vmem:[#allocation8 + $0x7e8] sm:$0xff] }
 0x1d7   :  { %2708 = vmatprep.subr.bf16.mxu1 %v2707_v42  ;;  %2740 = vmatprep.subr.bf16.mxu0 %v2739_v43  ;;  %v605_v39 = vld [vmem:[#allocation8 + $0xdc0] sm:$0xff]  ;;  %v575_v42 = vld [vmem:[#allocation8 + $0xcd0] sm:$0xff] }
 0x1d8   :  { %1761 = vmatprep.mubr.f32.mxu1 %v3053_v0  ;;  %1832 = vmatprep.mubr.f32.mxu0 %v3053_v0  ;;  %v607_v43 = vld [vmem:[#allocation8 + $0xdd0] sm:$0xff]  ;;  %v2729_v48 = vpack.c.bf16 %v605_v39, %v573_v38  ;;  %v417_v38 = vld [vmem:[#allocation8 + $0x7e0] sm:$0xff]  ;;  %v2779_v39 = vpack.c.bf16 %v418_v31, %v386_v30  ;;  %v644_v30 = vld [vmem:[#allocation8 + $0xef8] sm:$0xff] }
 0x1d9   :  { %v2761_v49 = vpack.c.bf16 %v607_v43, %v575_v42  ;;  %v419_v42 = vld [vmem:[#allocation8 + $0x7f0] sm:$0xff]  ;;  %v450_v43 = vld [vmem:[#allocation8 + $0x8e8] sm:$0xff]  ;;  %v676_v31 = vld [vmem:[#allocation8 + $0xff8] sm:$0xff] }
 0x1da   :  { %2710 = vmatpush1.bf16.msra.mxu1 %v2709_v50  ;;  %2742 = vmatpush1.bf16.msra.mxu0 %v2741_v51  ;;  %v637_v50 = vld [vmem:[#allocation8 + $0xec0] sm:$0xff] }
 0x1db   :  { %2712 = vmatprep.subr.bf16.mxu1 %v2711_v54  ;;  %2744 = vmatprep.subr.bf16.mxu0 %v2743_v55  ;;  %v669_v51 = vld [vmem:[#allocation8 + $0xfc0] sm:$0xff]  ;;  %v639_v54 = vld [vmem:[#allocation8 + $0xed0] sm:$0xff] }
 0x1dc   :  { %v671_v55 = vld [vmem:[#allocation8 + $0xfd0] sm:$0xff]  ;;  %v2733_v61 = vpack.c.bf16 %v669_v51, %v637_v50  ;;  %v481_v50 = vld [vmem:[#allocation8 + $0x9e0] sm:$0xff]  ;;  %v2783_v51 = vpack.c.bf16 %v482_v44, %v450_v43  ;;  %v2827_v44 = vpack.c.bf16 %v676_v31, %v644_v30 }
 0x1dd   :  { %v2765_v62 = vpack.c.bf16 %v671_v55, %v639_v54  ;;  %v483_v54 = vld [vmem:[#allocation8 + $0x9f0] sm:$0xff]  ;;  %v514_v55 = vld [vmem:[#allocation8 + $0xae8] sm:$0xff] }
 0x1de   :  { %2714 = vmatpush1.bf16.msra.mxu1 %v2713_v63  ;;  %2746 = vmatpush1.bf16.msra.mxu0 %v2745_v1  ;;  %v193_v63 = vld [vmem:[#allocation8 + $0xe0] sm:$0xff]  ;;  %v2787_v6 = vpack.c.bf16 %v546_v56, %v514_v55 }
 0x1df   :  { %2716 = vmatprep.subr.bf16.mxu1 %v2715_v4  ;;  %2748 = vmatprep.subr.bf16.mxu0 %v2747_v5  ;;  %v225_v1 = vld [vmem:[#allocation8 + $0x1e0] sm:$0xff]  ;;  %v195_v4 = vld [vmem:[#allocation8 + $0xf0] sm:$0xff] }
 0x1e0   :  { %v227_v5 = vld [vmem:[#allocation8 + $0x1f0] sm:$0xff]  ;;  %v2769_v10 = vpack.c.bf16 %v225_v1, %v193_v63 }
 0x1e1   :  { %v2801_v11 = vpack.c.bf16 %v227_v5, %v195_v4  ;;  %v513_v4 = vld [vmem:[#allocation8 + $0xae0] sm:$0xff] }
 0x1e2   :  { %2718 = vmatpush1.bf16.msra.mxu1 %v2717_v12  ;;  %2750 = vmatpush1.bf16.msra.mxu0 %v2749_v13  ;;  %v257_v12 = vld [vmem:[#allocation8 + $0x2e0] sm:$0xff] }
 0x1e3   :  { %2720 = vmatprep.subr.bf16.mxu1 %v2719_v16  ;;  %2752 = vmatprep.subr.bf16.mxu0 %v2751_v17  ;;  %v289_v13 = vld [vmem:[#allocation8 + $0x3e0] sm:$0xff]  ;;  %v259_v16 = vld [vmem:[#allocation8 + $0x2f0] sm:$0xff] }
 0x1e4   :  { %v291_v17 = vld [vmem:[#allocation8 + $0x3f0] sm:$0xff]  ;;  %v2773_v22 = vpack.c.bf16 %v289_v13, %v257_v12  ;;  %v545_v5 = vld [vmem:[#allocation8 + $0xbe0] sm:$0xff]  ;;  %v580_v12 = vld [vmem:[#allocation8 + $0xcf8] sm:$0xff] }
 0x1e5   :  { %v2805_v23 = vpack.c.bf16 %v291_v17, %v259_v16  ;;  %v612_v13 = vld [vmem:[#allocation8 + $0xdf8] sm:$0xff]  ;;  %v2789_v18 = vpack.c.bf16 %v545_v5, %v513_v4 }
 0x1e6   :  { %2722 = vmatpush1.bf16.msra.mxu1 %v2721_v24  ;;  %2754 = vmatpush1.bf16.msra.mxu0 %v2753_v25  ;;  %v321_v24 = vld [vmem:[#allocation8 + $0x4e0] sm:$0xff] }
 0x1e7   :  { %2724 = vmatprep.subr.bf16.mxu1 %v2723_v28  ;;  %2756 = vmatprep.subr.bf16.mxu0 %v2755_v29  ;;  %v353_v25 = vld [vmem:[#allocation8 + $0x5e0] sm:$0xff]  ;;  %v323_v28 = vld [vmem:[#allocation8 + $0x4f0] sm:$0xff] }
 0x1e8   :  { %v355_v29 = vld [vmem:[#allocation8 + $0x5f0] sm:$0xff]  ;;  %v2777_v35 = vpack.c.bf16 %v353_v25, %v321_v24 }
 0x1e9   :  { %v579_v24 = vld [vmem:[#allocation8 + $0xcf0] sm:$0xff] }
 0x1ea   :  { %2726 = vmatpush1.bf16.msra.mxu1 %v2725_v36  ;;  %2758 = vmatpush1.bf16.msra.mxu0 %v2757_v37  ;;  %v2809_v36 = vpack.c.bf16 %v355_v29, %v323_v28  ;;  %v385_v37 = vld [vmem:[#allocation8 + $0x6e0] sm:$0xff]  ;;  %v611_v25 = vld [vmem:[#allocation8 + $0xdf0] sm:$0xff]  ;;  %v674_v29 = vld [vmem:[#allocation8 + $0xfe8] sm:$0xff] }
 0x1eb   :  { %2728 = vmatprep.subr.bf16.mxu1 %v2727_v40  ;;  %2760 = vmatprep.subr.bf16.mxu0 %v2759_v41  ;;  %v2811_v40 = vpack.c.bf16 %v420_v33, %v388_v32  ;;  %v387_v41 = vld [vmem:[#allocation8 + $0x6f0] sm:$0xff] }
 0x1ee   :  { %2730 = vmatpush1.bf16.msra.mxu1 %v2729_v48  ;;  %2762 = vmatpush1.bf16.msra.mxu0 %v2761_v49  ;;  %v2813_v48 = vpack.c.bf16 %v419_v42, %v387_v41  ;;  %v449_v49 = vld [vmem:[#allocation8 + $0x8e0] sm:$0xff] }
 0x1ef   :  { %2732 = vmatprep.subr.bf16.mxu1 %v2731_v52  ;;  %2764 = vmatprep.subr.bf16.mxu0 %v2763_v53  ;;  %v2815_v52 = vpack.c.bf16 %v484_v46, %v452_v45  ;;  %v451_v53 = vld [vmem:[#allocation8 + $0x8f0] sm:$0xff]  ;;  %v2785_v63 = vpack.c.bf16 %v481_v50, %v449_v49  ;;  %v673_v45 = vld [vmem:[#allocation8 + $0xfe0] sm:$0xff] }
 0x1f0   :  { %v2817_v1 = vpack.c.bf16 %v483_v54, %v451_v53  ;;  %v643_v46 = vld [vmem:[#allocation8 + $0xef0] sm:$0xff] }
 0x1f2   :  { %2734 = vmatpush1.bf16.msra.mxu1 %v2733_v61  ;;  %2766 = vmatpush1.bf16.msra.mxu0 %v2765_v62  ;;  %v3194_v61 = vsub.s32 2, %v3188_v47  ;;  %v3197_v62 = vsub.s32 1, %v3188_v47 }
 0x1f3   :  { %2768 = vmatprep.subr.bf16.mxu1 %v2767_v2  ;;  %2800 = vmatprep.subr.bf16.mxu0 %v2799_v3  ;;  %v3199_v2 = vld [vmem:[#allocation10] sm:$0xff]  ;;  %v3202_v3 = vsub.s32 3, %v3188_v47 }
 0x1f4   :  { %v692_v16 = vrot.slane %v3199_v2, %v3197_v62 }
 0x1f5   :  { %1762 = vmatmul.mubr.f32.vlgmr.msra.gmra.mrb[12].mxu1 %v3158_v58  ;;  %1833 = vmatmul.mubr.f32.vlgmr.msra.gmra.mrb[14].mxu0 %v3158_v58  ;;  %v700_v17 = vrot.slane %v3199_v2, %v3202_v3 }
 0x1f6   :  { %2770 = vmatpush1.bf16.msra.mxu1 %v2769_v10  ;;  %2802 = vmatpush1.bf16.msra.mxu0 %v2801_v11  ;;  %v578_v10 = vld [vmem:[#allocation8 + $0xce8] sm:$0xff] }
 0x1f7   :  { %2772 = vmatprep.subr.bf16.mxu1 %v2771_v14  ;;  %2804 = vmatprep.subr.bf16.mxu0 %v2803_v15  ;;  %v610_v11 = vld [vmem:[#allocation8 + $0xde8] sm:$0xff]  ;;  %v688_v14 = vrot.slane %v3199_v2, %v3191_v60  ;;  %v696_v15 = vrot.slane %v3199_v2, %v3194_v61 }
 0x1f8   :  { %1903 = vmatprep.mubr.f32.mxu1 %v3053_v0  ;;  %1974 = vmatprep.mubr.f32.mxu0 %v3053_v0  ;;  %v2781_v0 = vpack.c.bf16 %v417_v38, %v385_v37 }
 0x1fa   :  { %2774 = vmatpush1.bf16.msra.mxu1 %v2773_v22  ;;  %2806 = vmatpush1.bf16.msra.mxu0 %v2805_v23  ;;  %v2791_v22 = vpack.c.bf16 %v610_v11, %v578_v10  ;;  %v2823_v23 = vpack.c.bf16 %v612_v13, %v580_v12 }
 0x1fb   :  { %2776 = vmatprep.subr.bf16.mxu1 %v2775_v26  ;;  %2808 = vmatprep.subr.bf16.mxu0 %v2807_v27  ;;  %v642_v26 = vld [vmem:[#allocation8 + $0xee8] sm:$0xff] }
 0x1fc   :  { %v2795_v43 = vpack.c.bf16 %v674_v29, %v642_v26 }
 0x1fe   :  { %2778 = vmatpush1.bf16.msra.mxu1 %v2777_v35  ;;  %2810 = vmatpush1.bf16.msra.mxu0 %v2809_v36  ;;  %v2793_v36 = vpack.c.bf16 %v609_v21, %v577_v20 }
 0x1ff   :  { %2780 = vmatprep.subr.bf16.mxu1 %v2779_v39  ;;  %2812 = vmatprep.subr.bf16.mxu0 %v2811_v40  ;;  %v2825_v39 = vpack.c.bf16 %v611_v25, %v579_v24  ;;  %v641_v40 = vld [vmem:[#allocation8 + $0xee0] sm:$0xff] }
 0x200   :  { %v2797_v50 = vpack.c.bf16 %v673_v45, %v641_v40 }
 0x202   :  { %2782 = vmatpush1.bf16.msra.mxu1 %v2781_v0  ;;  %2814 = vmatpush1.bf16.msra.mxu0 %v2813_v48  ;;  %v675_v0 = vld [vmem:[#allocation8 + $0xff0] sm:$0xff] }
 0x203   :  { %2784 = vmatprep.subr.bf16.mxu1 %v2783_v51  ;;  %2816 = vmatprep.subr.bf16.mxu0 %v2815_v52  ;;  %v2829_v51 = vpack.c.bf16 %v675_v0, %v643_v46  ;;  %v3055_v52 = vmov 1983009808  }
 0x204   :  { %v2144_v53 = vunpack.c.l.s4 %v3055_v52 }
 0x206   :  { %2786 = vmatpush1.bf16.msra.mxu1 %v2785_v63  ;;  %2818 = vmatpush1.bf16.msra.mxu0 %v2817_v1  ;;  %v2145_v57 = vunpack.c.0.s8 %v2144_v53 }
 0x207   :  { %2788 = vmatprep.subr.bf16.mxu1 %v2787_v6  ;;  %2820 = vmatprep.subr.bf16.mxu0 %v2819_v7 }
 0x208   :  { %v911_v27 = vpop.f32.mrb[0].mxu1  ;;  %v982_v28 = vpop.f32.mrb[2].mxu0  ;;  %v3215_v9 = vsub.s32 %v2145_v57, %v3188_v47 }
 0x209   :  { %v912_v32 = vadd.f32 %v911_v27, %v688_v14  ;;  %v983_v33 = vadd.f32 %v982_v28, %v696_v15  ;;  %v913_v34 = vpop.f32.mrb[1].mxu1  ;;  %v984_v35 = vpop.f32.mrb[3].mxu0  ;;  %v3220_v14 = vsub.s32 4, %v3188_v47  ;;  %v3223_v15 = vsub.s32 6, %v3188_v47 }
 0x20a   :  { %v914_v37 = vadd.f32 %v913_v34, %v692_v16  ;;  %v985_v38 = vadd.f32 %v984_v35, %v700_v17  ;;  %2790 = vmatpush1.bf16.msra.mxu1 %v2789_v18  ;;  %2822 = vmatpush1.bf16.msra.mxu0 %v2821_v19  ;;  %v3226_v16 = vsub.s32 5, %v3188_v47  ;;  %v3229_v17 = vsub.s32 7, %v3188_v47 }
 0x20b   :  { %v1981_v41 = vmul.f32 0.5, %v912_v32  ;;  %v1983_v42 = vmul.f32 0.5, %v983_v33  ;;  %2792 = vmatprep.subr.bf16.mxu1 %v2791_v22  ;;  %2824 = vmatprep.subr.bf16.mxu0 %v2823_v23  ;;  %v704_v19 = vrot.slane %v3199_v2, %v3220_v14  ;;  %v712_v20 = vrot.slane %v3199_v2, %v3223_v15 }
 0x20c   :  { %v1982_v48 = vmul.f32 0.5, %v914_v37  ;;  %v1984_v49 = vmul.f32 0.5, %v985_v38  ;;  %v708_v21 = vrot.slane %v3199_v2, %v3226_v16  ;;  %v716_v22 = vrot.slane %v3199_v2, %v3229_v17 }
 0x20d   :  { %2842 = vtanh.f32 %v1981_v41 }
 0x20e   :  { %2844 = vtanh.f32 %v1983_v42  ;;  %2794 = vmatpush1.bf16.msra.mxu1 %v2793_v36  ;;  %2826 = vmatpush1.bf16.msra.mxu0 %v2825_v39 }
 0x20f   :  { %2846 = vtanh.f32 %v1982_v48  ;;  %2796 = vmatprep.subr.bf16.mxu1 %v2795_v43  ;;  %2828 = vmatprep.subr.bf16.mxu0 %v2827_v44 }
 0x210   :  { %2848 = vtanh.f32 %v1984_v49  ;;  %v678_v49 = vld [vmem:[#allocation10 + $0x8] sm:$0xff] }
 0x211   :  { %v728_v52 = vrot.slane %v678_v49, %v3194_v61  ;;  %v724_v53 = vrot.slane %v678_v49, %v3197_v62 }
 0x212   :  { %2798 = vmatpush1.bf16.msra.mxu1 %v2797_v50  ;;  %2830 = vmatpush1.bf16.msra.mxu0 %v2829_v51  ;;  %v720_v51 = vrot.slane %v678_v49, %v3191_v60 }
 0x215   :  { %1904 = vmatmul.mubr.f32.vlgmr.msra.gmra.mrb[14].mxu1 %v3158_v58  ;;  %1975 = vmatmul.mubr.f32.vlgmr.msra.gmra.mrb[16].mxu0 %v3158_v58 }
 0x217   :  { %v2843_v54 = vpop.eup %2842 }
 0x218   :  { %v2845_v55 = vpop.eup %2844  ;;  %v2045_v56 = vadd.f32 1.0, %v2843_v54  ;;  %v732_v54 = vrot.slane %v678_v49, %v3202_v3 }
 0x219   :  { %v2847_v59 = vpop.eup %2846  ;;  %v2047_v63 = vadd.f32 1.0, %v2845_v55 }
 0x21a   :  { %v2849_v1 = vpop.eup %2848  ;;  %v2077_v4 = vmul.f32 0.5, %v2045_v56  ;;  %v2046_v5 = vadd.f32 1.0, %v2847_v59 }
 0x21b   :  { %v2079_v6 = vmul.f32 0.5, %v2047_v63  ;;  %v2048_v7 = vadd.f32 1.0, %v2849_v1 }
 0x21c   :  { %v2078_v8 = vmul.f32 0.5, %v2046_v5 }
 0x21d   :  { %v2080_v10 = vmul.f32 0.5, %v2048_v7 }
 0x21e   :  { %v2141_v11 = vcombine.low %v2077_v4, %v2078_v8 }
 0x21f   :  { %v2142_v12 = vcombine.low %v2079_v6, %v2080_v10 }
 0x220   :  { %v2149_v58 = vrot.slane %v2141_v11, %v3215_v9 }
 0x221   :  { %v2156_v13 = vrot.slane %v2142_v12, %v3215_v9 }
 0x223   :  { %v2157_v18 = vcombine.low %v2149_v58, %v2156_v13 }
 0x225   :  { %2285 = vst [vmem:[#allocation11] sm:$0xff] %v2157_v18 }
 0x228   :  { %v1053_v23 = vpop.f32.mrb[2].mxu1  ;;  %v1124_v24 = vpop.f32.mrb[4].mxu0 }
 0x229   :  { %v1054_v25 = vadd.f32 %v1053_v23, %v704_v19  ;;  %v1125_v26 = vadd.f32 %v1124_v24, %v712_v20  ;;  %v1055_v47 = vpop.f32.mrb[3].mxu1  ;;  %v1126_v27 = vpop.f32.mrb[5].mxu0 }
 0x22a   :  { %v1056_v28 = vadd.f32 %v1055_v47, %v708_v21  ;;  %v1127_v29 = vadd.f32 %v1126_v27, %v716_v22 }
 0x22b   :  { %v1985_v30 = vmul.f32 0.5, %v1054_v25  ;;  %v1987_v31 = vmul.f32 0.5, %v1125_v26 }
 0x22c   :  { %v1986_v32 = vmul.f32 0.5, %v1056_v28  ;;  %v1988_v33 = vmul.f32 0.5, %v1127_v29 }
 0x22d   :  { %2850 = vtanh.f32 %v1985_v30  ;;  %v736_v30 = vrot.slane %v678_v49, %v3220_v14 }
 0x22e   :  { %2852 = vtanh.f32 %v1987_v31  ;;  %v744_v31 = vrot.slane %v678_v49, %v3223_v15 }
 0x22f   :  { %2854 = vtanh.f32 %v1986_v32  ;;  %v740_v32 = vrot.slane %v678_v49, %v3226_v16 }
 0x230   :  { %2856 = vtanh.f32 %v1988_v33  ;;  %v748_v33 = vrot.slane %v678_v49, %v3229_v17 }
 0x237   :  { %v2851_v34 = vpop.eup %2850 }
 0x238   :  { %v2853_v35 = vpop.eup %2852  ;;  %v2049_v36 = vadd.f32 1.0, %v2851_v34 }
 0x239   :  { %v2855_v2 = vpop.eup %2854  ;;  %v2051_v37 = vadd.f32 1.0, %v2853_v35 }
 0x23a   :  { %v2857_v38 = vpop.eup %2856  ;;  %v2081_v39 = vmul.f32 0.5, %v2049_v36  ;;  %v2050_v40 = vadd.f32 1.0, %v2855_v2 }
 0x23b   :  { %v2083_v41 = vmul.f32 0.5, %v2051_v37  ;;  %v2052_v42 = vadd.f32 1.0, %v2857_v38 }
 0x23c   :  { %v2082_v43 = vmul.f32 0.5, %v2050_v40 }
 0x23d   :  { %v2084_v44 = vmul.f32 0.5, %v2052_v42 }
 0x23e   :  { %v2158_v45 = vcombine.low %v2081_v39, %v2082_v43 }
 0x23f   :  { %v2159_v46 = vcombine.low %v2083_v41, %v2084_v44 }
 0x240   :  { %v2166_v0 = vrot.slane %v2158_v45, %v3215_v9 }
 0x241   :  { %v2173_v48 = vrot.slane %v2159_v46, %v3215_v9 }
 0x243   :  { %v2174_v50 = vcombine.low %v2166_v0, %v2173_v48 }
 0x245   :  { %2286 = vst [vmem:[#allocation11 + $0x8] sm:$0xff] %v2174_v50 }
 0x248   :  { %v1195_v55 = vpop.f32.mrb[4].mxu1  ;;  %v1266_v56 = vpop.f32.mrb[6].mxu0 }
 0x249   :  { %v1196_v57 = vadd.f32 %v1195_v55, %v720_v51  ;;  %v1267_v59 = vadd.f32 %v1266_v56, %v728_v52  ;;  %v1197_v63 = vpop.f32.mrb[5].mxu1  ;;  %v1268_v1 = vpop.f32.mrb[7].mxu0 }
 0x24a   :  { %v1198_v4 = vadd.f32 %v1197_v63, %v724_v53  ;;  %v1269_v5 = vadd.f32 %v1268_v1, %v732_v54 }
 0x24b   :  { %v1989_v6 = vmul.f32 0.5, %v1196_v57  ;;  %v1991_v7 = vmul.f32 0.5, %v1267_v59 }
 0x24c   :  { %v1990_v8 = vmul.f32 0.5, %v1198_v4  ;;  %v1992_v10 = vmul.f32 0.5, %v1269_v5  ;;  %v679_v4 = vld [vmem:[#allocation10 + $0x10] sm:$0xff] }
 0x24d   :  { %2858 = vtanh.f32 %v1989_v6  ;;  %v752_v6 = vrot.slane %v679_v4, %v3191_v60 }
 0x24e   :  { %2860 = vtanh.f32 %v1991_v7  ;;  %v760_v7 = vrot.slane %v679_v4, %v3194_v61 }
 0x24f   :  { %2862 = vtanh.f32 %v1990_v8  ;;  %v756_v8 = vrot.slane %v679_v4, %v3197_v62 }
 0x250   :  { %2864 = vtanh.f32 %v1992_v10  ;;  %v764_v10 = vrot.slane %v679_v4, %v3202_v3 }
 0x257   :  { %v2859_v11 = vpop.eup %2858 }
 0x258   :  { %v2861_v12 = vpop.eup %2860  ;;  %v2053_v58 = vadd.f32 1.0, %v2859_v11 }
 0x259   :  { %v2863_v13 = vpop.eup %2862  ;;  %v2055_v18 = vadd.f32 1.0, %v2861_v12 }
 0x25a   :  { %v2865_v19 = vpop.eup %2864  ;;  %v2085_v20 = vmul.f32 0.5, %v2053_v58  ;;  %v2054_v21 = vadd.f32 1.0, %v2863_v13 }
 0x25b   :  { %v2087_v22 = vmul.f32 0.5, %v2055_v18  ;;  %v2056_v23 = vadd.f32 1.0, %v2865_v19 }
 0x25c   :  { %v2086_v24 = vmul.f32 0.5, %v2054_v21 }
 0x25d   :  { %v2088_v25 = vmul.f32 0.5, %v2056_v23 }
 0x25e   :  { %v2175_v26 = vcombine.low %v2085_v20, %v2086_v24 }
 0x25f   :  { %v2176_v47 = vcombine.low %v2087_v22, %v2088_v25 }
 0x260   :  { %v2183_v27 = vrot.slane %v2175_v26, %v3215_v9 }
 0x261   :  { %v2190_v28 = vrot.slane %v2176_v47, %v3215_v9 }
 0x263   :  { %v2191_v29 = vcombine.low %v2183_v27, %v2190_v28 }
 0x265   :  { %2287 = vst [vmem:[#allocation11 + $0x10] sm:$0xff] %v2191_v29 }
 0x268   :  { %v1337_v34 = vpop.f32.mrb[6].mxu1  ;;  %v1408_v35 = vpop.f32.mrb[8].mxu0 }
 0x269   :  { %v1338_v36 = vadd.f32 %v1337_v34, %v736_v30  ;;  %v1409_v2 = vadd.f32 %v1408_v35, %v744_v31  ;;  %v1339_v37 = vpop.f32.mrb[7].mxu1  ;;  %v1410_v38 = vpop.f32.mrb[9].mxu0 }
 0x26a   :  { %v1340_v39 = vadd.f32 %v1339_v37, %v740_v32  ;;  %v1411_v40 = vadd.f32 %v1410_v38, %v748_v33 }
 0x26b   :  { %v1993_v41 = vmul.f32 0.5, %v1338_v36  ;;  %v1995_v42 = vmul.f32 0.5, %v1409_v2 }
 0x26c   :  { %v1994_v43 = vmul.f32 0.5, %v1340_v39  ;;  %v1996_v44 = vmul.f32 0.5, %v1411_v40 }
 0x26d   :  { %2866 = vtanh.f32 %v1993_v41  ;;  %v768_v41 = vrot.slane %v679_v4, %v3220_v14 }
 0x26e   :  { %2868 = vtanh.f32 %v1995_v42  ;;  %v776_v42 = vrot.slane %v679_v4, %v3223_v15 }
 0x26f   :  { %2870 = vtanh.f32 %v1994_v43  ;;  %v772_v43 = vrot.slane %v679_v4, %v3226_v16 }
 0x270   :  { %2872 = vtanh.f32 %v1996_v44  ;;  %v780_v44 = vrot.slane %v679_v4, %v3229_v17 }
 0x277   :  { %v2867_v45 = vpop.eup %2866 }
 0x278   :  { %v2869_v46 = vpop.eup %2868  ;;  %v2057_v0 = vadd.f32 1.0, %v2867_v45 }
 0x279   :  { %v2871_v48 = vpop.eup %2870  ;;  %v2059_v49 = vadd.f32 1.0, %v2869_v46 }
 0x27a   :  { %v2873_v50 = vpop.eup %2872  ;;  %v2089_v51 = vmul.f32 0.5, %v2057_v0  ;;  %v2058_v52 = vadd.f32 1.0, %v2871_v48 }
 0x27b   :  { %v2091_v53 = vmul.f32 0.5, %v2059_v49  ;;  %v2060_v54 = vadd.f32 1.0, %v2873_v50 }
 0x27c   :  { %v2090_v55 = vmul.f32 0.5, %v2058_v52 }
 0x27d   :  { %v2092_v56 = vmul.f32 0.5, %v2060_v54 }
 0x27e   :  { %v2192_v57 = vcombine.low %v2089_v51, %v2090_v55 }
 0x27f   :  { %v2193_v59 = vcombine.low %v2091_v53, %v2092_v56 }
 0x280   :  { %v2200_v63 = vrot.slane %v2192_v57, %v3215_v9 }
 0x281   :  { %v2207_v1 = vrot.slane %v2193_v59, %v3215_v9 }
 0x283   :  { %v2208_v5 = vcombine.low %v2200_v63, %v2207_v1 }
 0x285   :  { %2288 = vst [vmem:[#allocation11 + $0x18] sm:$0xff] %v2208_v5 }
 0x288   :  { %v1479_v11 = vpop.f32.mrb[8].mxu1  ;;  %v1550_v12 = vpop.f32.mrb[10].mxu0 }
 0x289   :  { %v1480_v58 = vadd.f32 %v1479_v11, %v752_v6  ;;  %v1551_v13 = vadd.f32 %v1550_v12, %v760_v7  ;;  %v1481_v18 = vpop.f32.mrb[9].mxu1  ;;  %v1552_v19 = vpop.f32.mrb[11].mxu0 }
 0x28a   :  { %v1482_v20 = vadd.f32 %v1481_v18, %v756_v8  ;;  %v1553_v21 = vadd.f32 %v1552_v19, %v764_v10 }
 0x28b   :  { %v1997_v22 = vmul.f32 0.5, %v1480_v58  ;;  %v1999_v23 = vmul.f32 0.5, %v1551_v13 }
 0x28c   :  { %v1998_v24 = vmul.f32 0.5, %v1482_v20  ;;  %v2000_v25 = vmul.f32 0.5, %v1553_v21  ;;  %v680_v20 = vld [vmem:[#allocation10 + $0x18] sm:$0xff] }
 0x28d   :  { %2874 = vtanh.f32 %v1997_v22  ;;  %v784_v22 = vrot.slane %v680_v20, %v3191_v60 }
 0x28e   :  { %2876 = vtanh.f32 %v1999_v23  ;;  %v792_v23 = vrot.slane %v680_v20, %v3194_v61 }
 0x28f   :  { %2878 = vtanh.f32 %v1998_v24  ;;  %v788_v24 = vrot.slane %v680_v20, %v3197_v62 }
 0x290   :  { %2880 = vtanh.f32 %v2000_v25  ;;  %v796_v25 = vrot.slane %v680_v20, %v3202_v3 }
 0x297   :  { %v2875_v26 = vpop.eup %2874 }
 0x298   :  { %v2877_v47 = vpop.eup %2876  ;;  %v2061_v27 = vadd.f32 1.0, %v2875_v26 }
 0x299   :  { %v2879_v28 = vpop.eup %2878  ;;  %v2063_v29 = vadd.f32 1.0, %v2877_v47 }
 0x29a   :  { %v2881_v30 = vpop.eup %2880  ;;  %v2093_v31 = vmul.f32 0.5, %v2061_v27  ;;  %v2062_v32 = vadd.f32 1.0, %v2879_v28 }
 0x29b   :  { %v2095_v33 = vmul.f32 0.5, %v2063_v29  ;;  %v2064_v34 = vadd.f32 1.0, %v2881_v30 }
 0x29c   :  { %v2094_v35 = vmul.f32 0.5, %v2062_v32 }
 0x29d   :  { %v2096_v36 = vmul.f32 0.5, %v2064_v34 }
 0x29e   :  { %v2209_v2 = vcombine.low %v2093_v31, %v2094_v35 }
 0x29f   :  { %v2210_v37 = vcombine.low %v2095_v33, %v2096_v36 }
 0x2a0   :  { %v2217_v38 = vrot.slane %v2209_v2, %v3215_v9 }
 0x2a1   :  { %v2224_v39 = vrot.slane %v2210_v37, %v3215_v9 }
 0x2a3   :  { %v2225_v40 = vcombine.low %v2217_v38, %v2224_v39 }
 0x2a5   :  { %2289 = vst [vmem:[#allocation11 + $0x20] sm:$0xff] %v2225_v40 }
 0x2a8   :  { %v1621_v45 = vpop.f32.mrb[10].mxu1  ;;  %v1692_v46 = vpop.f32.mrb[12].mxu0 }
 0x2a9   :  { %v1622_v0 = vadd.f32 %v1621_v45, %v768_v41  ;;  %v1693_v48 = vadd.f32 %v1692_v46, %v776_v42  ;;  %v1623_v49 = vpop.f32.mrb[11].mxu1  ;;  %v1694_v50 = vpop.f32.mrb[13].mxu0 }
 0x2aa   :  { %v1624_v51 = vadd.f32 %v1623_v49, %v772_v43  ;;  %v1695_v52 = vadd.f32 %v1694_v50, %v780_v44  ;;  %v800_v49 = vrot.slane %v680_v20, %v3220_v14  ;;  %v808_v50 = vrot.slane %v680_v20, %v3223_v15 }
 0x2ab   :  { %v2001_v53 = vmul.f32 0.5, %v1622_v0  ;;  %v2003_v54 = vmul.f32 0.5, %v1693_v48 }
 0x2ac   :  { %v2002_v55 = vmul.f32 0.5, %v1624_v51  ;;  %v2004_v56 = vmul.f32 0.5, %v1695_v52  ;;  %v804_v51 = vrot.slane %v680_v20, %v3226_v16  ;;  %v812_v52 = vrot.slane %v680_v20, %v3229_v17 }
 0x2ad   :  { %2882 = vtanh.f32 %v2001_v53 }
 0x2ae   :  { %2884 = vtanh.f32 %v2003_v54 }
 0x2af   :  { %2886 = vtanh.f32 %v2002_v55 }
 0x2b0   :  { %2888 = vtanh.f32 %v2004_v56 }
 0x2b7   :  { %v2883_v57 = vpop.eup %2882 }
 0x2b8   :  { %v2885_v59 = vpop.eup %2884  ;;  %v2065_v63 = vadd.f32 1.0, %v2883_v57 }
 0x2b9   :  { %v2887_v1 = vpop.eup %2886  ;;  %v2067_v4 = vadd.f32 1.0, %v2885_v59 }
 0x2ba   :  { %v2889_v5 = vpop.eup %2888  ;;  %v2097_v6 = vmul.f32 0.5, %v2065_v63  ;;  %v2066_v7 = vadd.f32 1.0, %v2887_v1 }
 0x2bb   :  { %v2099_v8 = vmul.f32 0.5, %v2067_v4  ;;  %v2068_v10 = vadd.f32 1.0, %v2889_v5 }
 0x2bc   :  { %v2098_v11 = vmul.f32 0.5, %v2066_v7 }
 0x2bd   :  { %v2100_v12 = vmul.f32 0.5, %v2068_v10 }
 0x2be   :  { %v2226_v58 = vcombine.low %v2097_v6, %v2098_v11 }
 0x2bf   :  { %v2227_v13 = vcombine.low %v2099_v8, %v2100_v12 }
 0x2c0   :  { %v2234_v18 = vrot.slane %v2226_v58, %v3215_v9 }
 0x2c1   :  { %v2241_v19 = vrot.slane %v2227_v13, %v3215_v9 }
 0x2c3   :  { %v2242_v21 = vcombine.low %v2234_v18, %v2241_v19 }
 0x2c5   :  { %2290 = vst [vmem:[#allocation11 + $0x28] sm:$0xff] %v2242_v21 }
 0x2c8   :  { %v1763_v26 = vpop.f32.mrb[12].mxu1  ;;  %v1834_v47 = vpop.f32.mrb[14].mxu0 }
 0x2c9   :  { %v1764_v27 = vadd.f32 %v1763_v26, %v784_v22  ;;  %v1835_v28 = vadd.f32 %v1834_v47, %v792_v23  ;;  %v1765_v29 = vpop.f32.mrb[13].mxu1  ;;  %v1836_v30 = vpop.f32.mrb[15].mxu0 }
 0x2ca   :  { %v1766_v31 = vadd.f32 %v1765_v29, %v788_v24  ;;  %v1837_v32 = vadd.f32 %v1836_v30, %v796_v25 }
 0x2cb   :  { %v2005_v33 = vmul.f32 0.5, %v1764_v27  ;;  %v2007_v34 = vmul.f32 0.5, %v1835_v28 }
 0x2cc   :  { %v2006_v35 = vmul.f32 0.5, %v1766_v31  ;;  %v2008_v36 = vmul.f32 0.5, %v1837_v32 }
 0x2cd   :  { %2890 = vtanh.f32 %v2005_v33 }
 0x2ce   :  { %2892 = vtanh.f32 %v2007_v34 }
 0x2cf   :  { %2894 = vtanh.f32 %v2006_v35 }
 0x2d0   :  { %2896 = vtanh.f32 %v2008_v36 }
 0x2d7   :  { %v2891_v60 = vpop.eup %2890 }
 0x2d8   :  { %v2893_v61 = vpop.eup %2892  ;;  %v2069_v62 = vadd.f32 1.0, %v2891_v60 }
 0x2d9   :  { %v2895_v3 = vpop.eup %2894  ;;  %v2071_v2 = vadd.f32 1.0, %v2893_v61 }
 0x2da   :  { %v2897_v37 = vpop.eup %2896  ;;  %v2101_v38 = vmul.f32 0.5, %v2069_v62  ;;  %v2070_v39 = vadd.f32 1.0, %v2895_v3 }
 0x2db   :  { %v2103_v40 = vmul.f32 0.5, %v2071_v2  ;;  %v2072_v41 = vadd.f32 1.0, %v2897_v37 }
 0x2dc   :  { %v2102_v42 = vmul.f32 0.5, %v2070_v39 }
 0x2dd   :  { %v2104_v43 = vmul.f32 0.5, %v2072_v41 }
 0x2de   :  { %v2243_v44 = vcombine.low %v2101_v38, %v2102_v42 }
 0x2df   :  { %v2244_v45 = vcombine.low %v2103_v40, %v2104_v43 }
 0x2e0   :  { %v2251_v46 = vrot.slane %v2243_v44, %v3215_v9 }
 0x2e1   :  { %v2258_v0 = vrot.slane %v2244_v45, %v3215_v9 }
 0x2e3   :  { %v2259_v48 = vcombine.low %v2251_v46, %v2258_v0 }
 0x2e5   :  { %2291 = vst [vmem:[#allocation11 + $0x30] sm:$0xff] %v2259_v48 }
 0x2e8   :  { %v1905_v53 = vpop.f32.mrb[14].mxu1  ;;  %v1976_v54 = vpop.f32.mrb[16].mxu0 }
 0x2e9   :  { %v1906_v55 = vadd.f32 %v1905_v53, %v800_v49  ;;  %v1977_v56 = vadd.f32 %v1976_v54, %v808_v50  ;;  %v1907_v57 = vpop.f32.mrb[15].mxu1  ;;  %v1978_v59 = vpop.f32.mrb[17].mxu0 }
 0x2ea   :  { %v1908_v63 = vadd.f32 %v1907_v57, %v804_v51  ;;  %v1979_v1 = vadd.f32 %v1978_v59, %v812_v52 }
 0x2eb   :  { %v2009_v4 = vmul.f32 0.5, %v1906_v55  ;;  %v2011_v5 = vmul.f32 0.5, %v1977_v56 }
 0x2ec   :  { %v2010_v6 = vmul.f32 0.5, %v1908_v63  ;;  %v2012_v7 = vmul.f32 0.5, %v1979_v1 }
 0x2ed   :  { %2898 = vtanh.f32 %v2009_v4 }
 0x2ee   :  { %2900 = vtanh.f32 %v2011_v5 }
 0x2ef   :  { %2902 = vtanh.f32 %v2010_v6 }
 0x2f0   :  { %2904 = vtanh.f32 %v2012_v7 }
 0x2f7   :  { %v2899_v14 = vpop.eup %2898 }
 0x2f8   :  { %v2901_v15 = vpop.eup %2900  ;;  %v2073_v16 = vadd.f32 1.0, %v2899_v14 }
 0x2f9   :  { %v2903_v17 = vpop.eup %2902  ;;  %v2075_v8 = vadd.f32 1.0, %v2901_v15 }
 0x2fa   :  { %v2905_v10 = vpop.eup %2904  ;;  %v2105_v11 = vmul.f32 0.5, %v2073_v16  ;;  %v2074_v12 = vadd.f32 1.0, %v2903_v17 }
 0x2fb   :  { %v2107_v58 = vmul.f32 0.5, %v2075_v8  ;;  %v2076_v13 = vadd.f32 1.0, %v2905_v10 }
 0x2fc   :  { %v2106_v18 = vmul.f32 0.5, %v2074_v12 }
 0x2fd   :  { %v2108_v19 = vmul.f32 0.5, %v2076_v13 }
 0x2fe   :  { %v2260_v20 = vcombine.low %v2105_v11, %v2106_v18 }
 0x2ff   :  { %v2261_v21 = vcombine.low %v2107_v58, %v2108_v19 }
 0x300   :  { %v2268_v22 = vrot.slane %v2260_v20, %v3215_v9 }
 0x301   :  { %v2275_v23 = vrot.slane %v2261_v21, %v3215_v9 }
 0x303   :  { %v2276_v24 = vcombine.low %v2268_v22, %v2275_v23 }
 0x305   :  { %2292 = vst [vmem:[#allocation11 + $0x38] sm:$0xff] %v2276_v24 }
 0x306   :  { %3027 = shalt.err (!%p3024_p2)
}
 0x307   :  { %s3028_s21 = scalar_lea.hbm %s3294_s5, 1024 }
 0x308   :  { %p3029_p3 = scmp.ne.s32.totalorder %s3294_s5, %s3028_s21  ;;  %p3032_p4 = scmp.lt.u32.totalorder %s3028_s21, %s3294_s5 }
 0x30a   :  { %p3034_p5 = pnand %p3032_p4, %p3029_p3 }
 0x30c   :  { %3037 = shalt.err (!%p3034_p5)
}
 0x30d   :  { %2302 = dma.vmem_to_hbm [thread:$0]  %s2300_s27, 1024, %s3294_s5, [#allocation4]  }
 0x30e   :  { %3044 = dma.done.wait [#allocation4], 1024  }
 0x30f   :  { %3045 = vsyncadd [#allocation4], 4294966272 }
 0x310   :  { %2306 = vsyncpa [#allocation3], 1 }
 0x311   :  { %2307 = vsyncpa [#allocation6], 1 }
 0x312   :  { %2308 = vsyncpa [#allocation9], 1 }
 0x313   :  { %2309 = vsyncpa [#allocation4], 1 }

</bundles_post_ra>
